<compile_context>
chip_gen: v5e
topology: v5e:2x2
jax: 0.10.0
libtpu: 0.0.40
codegen_flags: <defaults>
</compile_context>

<pallas_src>
import functools

import jax
import jax.numpy as jnp
from jax.experimental import pallas as pl
from jax.experimental.pallas import tpu as pltpu

HIDDEN = 2000            # fixed by the module definition
HIDDEN_PAD = 2048        # 16 * 128 -> clean lane tiling
LANE = 128
BF16_SUBLANE = 16


def _round_up(x, m):
    return ((x + m - 1) // m) * m


def _use_bf16_elementwise():
    """bf16 VALU exists on v6e/v7x but not on v5e/v4 -> keep f32 there."""
    try:
        kind = jax.devices()[0].device_kind.lower()
    except Exception:
        return False
    return not any(tag in kind for tag in ("v2", "v3", "v4", "v5"))


def _choose_batch_tile(batch):
    """Pick a bf16-sublane-aligned batch tile.

    Score = padded rows (wasted compute) + per-step overhead (~0.35us ~= a few
    tens of rows of work) + a penalty for a 1-step grid (leaves the second
    v7x TensorCore idle when the batch could have been split)."""
    batch = max(int(batch), 1)

    def cost(tb):
        steps = -(-batch // tb)
        padded = steps * tb
        one_step_penalty = 2 * tb if (steps < 2 and batch > BF16_SUBLANE) else 0
        return padded + 32 * steps + one_step_penalty

    return min((512, 256, 128, 64, 32, 16), key=cost)


def _vmem_budget(tb, in_pad, out_pad):
    """VMEM bytes actually needed by the pipeline + headroom (clamped to the
    v7x 64 MiB per-core budget)."""
    bf16, f32 = 2, 4
    w1 = in_pad * HIDDEN_PAD * bf16                  # single-buffered (Buffered(1))
    w2 = HIDDEN_PAD * out_pad * bf16                 # single-buffered
    b1 = 8 * HIDDEN_PAD * f32                        # (1, .) pads to 8 sublanes
    b2 = 8 * out_pad * f32
    x_tile = 2 * tb * in_pad * bf16                  # double-buffered input tile
    o_tile = 2 * tb * out_pad * f32                  # double-buffered output tile
    h_scratch = tb * HIDDEN_PAD * (f32 + bf16)       # f32 h + bf16 copy for 2nd dot
    total = w1 + w2 + b1 + b2 + x_tile + o_tile + h_scratch
    budget = int(total * 1.5) + (4 << 20)            # compiler temporaries headroom
    return max(min(budget, 64 << 20), 4 << 20)


def _net_kernel(x_ref, w1_ref, b1_ref, w2_ref, b2_ref, o_ref, *,
                n, beta, bf16_elementwise):
    # hidden layer: Linear (bf16 operands, f32 MXU accumulation)
    h = jnp.dot(x_ref[...], w1_ref[...], preferred_element_type=jnp.float32)
    if bf16_elementwise:
        # v6e/v7x: bf16 VALU halves vreg traffic on the 2048-wide chain.
        h = jnp.maximum(h.astype(jnp.bfloat16) + b1_ref[...].astype(jnp.bfloat16),
                        0.0)
    else:
        # v5e/v4: no bf16 VALU -> stay f32 (kernel is MXU-bound there anyway).
        h = jnp.maximum(h + b1_ref[...], 0.0)
    if n == 2:
        h = h * h
    elif n != 1:
        h = h ** n                                   # Python int -> integer_pow
    # top layer: Linear (bf16 operands, f32 accumulation) + tanh(beta * .)
    o = jnp.dot(h.astype(jnp.bfloat16), w2_ref[...],
                preferred_element_type=jnp.float32)
    o = o + b2_ref[...]                              # b2 is (1, OUT_PAD) f32
    o_ref[...] = jnp.tanh(beta * o).astype(o_ref.dtype)


def prepare_params(w1, b1, w2, b2):
    """Pad input_dim -> multiple of 128, HIDDEN -> 2048, output_dim -> multiple
    of 128; cast weights to bf16.

    w1: (input_dim, 2000) f32, b1: (2000,) f32,
    w2: (2000, output_dim) f32, b2: (output_dim,) f32.
    """
    input_dim = w1.shape[0]
    output_dim = w2.shape[1]
    in_pad = _round_up(input_dim, LANE)
    out_pad = _round_up(output_dim, LANE)

    w1_p = jnp.pad(w1.astype(jnp.bfloat16),
                   ((0, in_pad - input_dim), (0, HIDDEN_PAD - HIDDEN)))
    b1_p = jnp.pad(b1.astype(jnp.float32),
                   (0, HIDDEN_PAD - HIDDEN)).reshape(1, HIDDEN_PAD)
    w2_p = jnp.pad(w2.astype(jnp.bfloat16),
                   ((0, HIDDEN_PAD - HIDDEN), (0, out_pad - output_dim)))
    b2_p = jnp.pad(b2.astype(jnp.float32),
                   (0, out_pad - output_dim)).reshape(1, out_pad)
    return w1_p, b1_p, w2_p, b2_p, output_dim


def net_forward(x, w1_p, b1_p, w2_p, b2_p, output_dim, *, n=1, beta=0.1):
    """x: (B, input_dim) f32. Padded bf16/f32 params from prepare_params."""
    assert isinstance(n, int) and n >= 1, "n must be a Python int >= 1"
    batch, input_dim = x.shape
    in_pad = w1_p.shape[0]
    out_pad = w2_p.shape[1]
    assert input_dim <= in_pad

    tb = _choose_batch_tile(batch)
    batch_pad = _round_up(batch, tb)

    # single jnp.pad: cast + pad batch rows and input columns in one copy
    x_p = jnp.pad(x.astype(jnp.bfloat16),
                  ((0, batch_pad - batch), (0, in_pad - input_dim)))

    kernel = functools.partial(_net_kernel, n=n, beta=float(beta),
                               bf16_elementwise=_use_bf16_elementwise())

    resident = pl.Buffered(1)   # constant index_map -> no double-buffering

    out = pl.pallas_call(
        kernel,
        out_shape=jax.ShapeDtypeStruct((batch_pad, out_pad), jnp.float32),
        grid=(batch_pad // tb,),
        in_specs=[
            pl.BlockSpec((tb, in_pad), lambda i: (i, 0)),               # x tile
            pl.BlockSpec((in_pad, HIDDEN_PAD), lambda i: (0, 0),
                         pipeline_mode=resident),                        # W1
            pl.BlockSpec((1, HIDDEN_PAD), lambda i: (0, 0),
                         pipeline_mode=resident),                        # b1
            pl.BlockSpec((HIDDEN_PAD, out_pad), lambda i: (0, 0),
                         pipeline_mode=resident),                        # W2
            pl.BlockSpec((1, out_pad), lambda i: (0, 0),
                         pipeline_mode=resident),                        # b2
        ],
        out_specs=pl.BlockSpec((tb, out_pad), lambda i: (i, 0)),
        compiler_params=pltpu.CompilerParams(
            dimension_semantics=("parallel",),
            vmem_limit_bytes=_vmem_budget(tb, in_pad, out_pad),
        ),
    )(x_p, w1_p, b1_p, w2_p, b2_p)

    return out[:batch, :output_dim]


def init_params(key, input_dim, output_dim):
    """Deterministic init mimicking PyTorch nn.Linear defaults
    (uniform in +/-1/sqrt(fan_in)). Stored transposed vs. torch layout."""
    k1, k2, k3, k4 = jax.random.split(key, 4)
    bound1 = 1.0 / jnp.sqrt(jnp.float32(input_dim))
    bound2 = 1.0 / jnp.sqrt(jnp.float32(HIDDEN))
    w1 = jax.random.uniform(k1, (input_dim, HIDDEN), jnp.float32, -bound1, bound1)
    b1 = jax.random.uniform(k2, (HIDDEN,), jnp.float32, -bound1, bound1)
    w2 = jax.random.uniform(k3, (HIDDEN, output_dim), jnp.float32, -bound2, bound2)
    b2 = jax.random.uniform(k4, (output_dim,), jnp.float32, -bound2, bound2)
    return w1, b1, w2, b2


if __name__ == "__main__":
    key = jax.random.PRNGKey(0)
    kx, kp = jax.random.split(key)

    batch, input_dim, output_dim = 8, 32, 10
    n, beta = 1, 0.1

    x = jax.random.normal(kx, (batch, input_dim), jnp.float32)
    w1, b1, w2, b2 = init_params(kp, input_dim, output_dim)
    w1_p, b1_p, w2_p, b2_p, out_dim = prepare_params(w1, b1, w2, b2)

    out = net_forward(x, w1_p, b1_p, w2_p, b2_p, out_dim, n=n, beta=beta)
    out = jax.block_until_ready(out)
    assert out.shape == (batch, output_dim)

    # precision-matched reference (bf16 MXU operands, f32 accumulation,
    # elementwise dtype matching what the kernel picked on this chip)
    xb = x.astype(jnp.bfloat16)
    h_acc = jnp.dot(xb, w1.astype(jnp.bfloat16),
                    preferred_element_type=jnp.float32)
    if _use_bf16_elementwise():
        h = jnp.maximum(h_acc.astype(jnp.bfloat16) + b1.astype(jnp.bfloat16),
                        0.0) ** n
    else:
        h = jnp.maximum(h_acc + b1, 0.0) ** n
    ref = jnp.tanh(beta * (
        jnp.dot(h.astype(jnp.bfloat16), w2.astype(jnp.bfloat16),
                preferred_element_type=jnp.float32) + b2))
    assert jnp.allclose(out, ref, atol=2e-3, rtol=2e-3), \
        float(jnp.max(jnp.abs(out - ref)))

    # loose sanity check against the full-f32 PyTorch-equivalent math
    ref_f32 = jnp.tanh(beta * ((jnp.maximum(x @ w1 + b1, 0.0) ** n) @ w2 + b2))
    assert jnp.allclose(out, ref_f32, atol=3e-2, rtol=3e-2)

    print("KERNEL_OK")
</pallas_src>

<mosaic_0001>
module attributes {stable_mosaic.version = 11 : i64} {
  func.func @_net_kernel(%arg0: i32, %arg1: memref<16x128xbf16, #tpu.memory_space<vmem>>, %arg2: memref<128x2048xbf16, #tpu.memory_space<vmem>>, %arg3: memref<1x2048xf32, #tpu.memory_space<vmem>>, %arg4: memref<2048x128xbf16, #tpu.memory_space<vmem>>, %arg5: memref<1x128xf32, #tpu.memory_space<vmem>>, %arg6: memref<16x128xf32, #tpu.memory_space<vmem>>) attributes {dimension_semantics = [#tpu.dimension_semantics<parallel>], iteration_bounds = array<i64: 1>, scalar_prefetch = 0 : i64, scratch_operands = 0 : i64, tpu.core_type = #tpu.core_type<tc>, window_params = [{transform_indices = @transform_0, window_bounds = array<i64: 16, 128>}, {pipeline_mode = #tpu.pipeline_mode<synchronous>, transform_indices = @transform_1, window_bounds = array<i64: 128, 2048>}, {pipeline_mode = #tpu.pipeline_mode<synchronous>, transform_indices = @transform_2, window_bounds = array<i64: 1, 2048>}, {pipeline_mode = #tpu.pipeline_mode<synchronous>, transform_indices = @transform_3, window_bounds = array<i64: 2048, 128>}, {pipeline_mode = #tpu.pipeline_mode<synchronous>, transform_indices = @transform_4, window_bounds = array<i64: 1, 128>}, {transform_indices = @transform_5, window_bounds = array<i64: 16, 128>}]} {
    %c0 = arith.constant 0 : index
    %c0_0 = arith.constant 0 : index
    %0 = vector.load %arg1[%c0, %c0_0] : memref<16x128xbf16, #tpu.memory_space<vmem>>, vector<16x128xbf16>
    %c0_1 = arith.constant 0 : index
    %c0_2 = arith.constant 0 : index
    %1 = vector.load %arg2[%c0_1, %c0_2] : memref<128x2048xbf16, #tpu.memory_space<vmem>>, vector<128x2048xbf16>
    %cst = arith.constant dense<0.000000e+00> : vector<16x2048xf32>
    %2 = tpu.matmul %0, %1, %cst {dimension_numbers = #tpu.dot_dimension_numbers<[1], [0], [0], [1], [0, 0, 1, 1], [], []>} : vector<16x128xbf16>, vector<128x2048xbf16>, vector<16x2048xf32> -> vector<16x2048xf32>
    %3 = arith.truncf %2 : vector<16x2048xf32> to vector<16x2048xbf16>
    %c0_3 = arith.constant 0 : index
    %c0_4 = arith.constant 0 : index
    %4 = vector.load %arg3[%c0_3, %c0_4] : memref<1x2048xf32, #tpu.memory_space<vmem>>, vector<1x2048xf32>
    %5 = arith.truncf %4 : vector<1x2048xf32> to vector<1x2048xbf16>
    %6 = vector.broadcast %5 : vector<1x2048xbf16> to vector<16x2048xbf16>
    %7 = arith.addf %3, %6 : vector<16x2048xbf16>
    %cst_5 = arith.constant 0.000000e+00 : bf16
    %8 = vector.broadcast %cst_5 : bf16 to vector<16x2048xbf16>
    %9 = arith.maximumf %7, %8 : vector<16x2048xbf16>
    %c0_6 = arith.constant 0 : index
    %c0_7 = arith.constant 0 : index
    %10 = vector.load %arg4[%c0_6, %c0_7] : memref<2048x128xbf16, #tpu.memory_space<vmem>>, vector<2048x128xbf16>
    %cst_8 = arith.constant dense<0.000000e+00> : vector<16x128xf32>
    %11 = tpu.matmul %9, %10, %cst_8 {dimension_numbers = #tpu.dot_dimension_numbers<[1], [0], [0], [1], [0, 0, 1, 1], [], []>} : vector<16x2048xbf16>, vector<2048x128xbf16>, vector<16x128xf32> -> vector<16x128xf32>
    %c0_9 = arith.constant 0 : index
    %c0_10 = arith.constant 0 : index
    %12 = vector.load %arg5[%c0_9, %c0_10] : memref<1x128xf32, #tpu.memory_space<vmem>>, vector<1x128xf32>
    %13 = vector.broadcast %12 : vector<1x128xf32> to vector<16x128xf32>
    %14 = arith.addf %11, %13 : vector<16x128xf32>
    %cst_11 = arith.constant 1.000000e-01 : f32
    %15 = vector.broadcast %cst_11 : f32 to vector<16x128xf32>
    %16 = arith.mulf %15, %14 : vector<16x128xf32>
    %17 = math.tanh %16 : vector<16x128xf32>
    %c0_12 = arith.constant 0 : index
    %c0_13 = arith.constant 0 : index
    %18 = vector.load %arg6[%c0_12, %c0_13] : memref<16x128xf32, #tpu.memory_space<vmem>>, vector<16x128xf32>
    tpu.vector_store %arg6[%c0_12, %c0_13], %17 {strides = array<i32>} : memref<16x128xf32, #tpu.memory_space<vmem>>, vector<16x128xf32>,
    return
  }
  func.func @transform_0(%arg0: i32) -> (i32, i32) {
    %c0_i32 = arith.constant 0 : i32
    %c0_i32_0 = arith.constant 0 : i32
    return %arg0, %c0_i32 : i32, i32
  }
  func.func @transform_1(%arg0: i32) -> (i32, i32) {
    %c0_i32 = arith.constant 0 : i32
    %c0_i32_0 = arith.constant 0 : i32
    %c0_i32_1 = arith.constant 0 : i32
    return %c0_i32, %c0_i32_0 : i32, i32
  }
  func.func @transform_2(%arg0: i32) -> (i32, i32) {
    %c0_i32 = arith.constant 0 : i32
    %c0_i32_0 = arith.constant 0 : i32
    %c0_i32_1 = arith.constant 0 : i32
    return %c0_i32, %c0_i32_0 : i32, i32
  }
  func.func @transform_3(%arg0: i32) -> (i32, i32) {
    %c0_i32 = arith.constant 0 : i32
    %c0_i32_0 = arith.constant 0 : i32
    %c0_i32_1 = arith.constant 0 : i32
    return %c0_i32, %c0_i32_0 : i32, i32
  }
  func.func @transform_4(%arg0: i32) -> (i32, i32) {
    %c0_i32 = arith.constant 0 : i32
    %c0_i32_0 = arith.constant 0 : i32
    %c0_i32_1 = arith.constant 0 : i32
    return %c0_i32, %c0_i32_0 : i32, i32
  }
  func.func @transform_5(%arg0: i32) -> (i32, i32) {
    %c0_i32 = arith.constant 0 : i32
    %c0_i32_0 = arith.constant 0 : i32
    return %arg0, %c0_i32 : i32, i32
  }
}

</mosaic_0001>

<bundles_post_ra>
// kernel: tpu_custom_call.1
= control target key start
LH: loop header
LB: loop body
LE: loop exit
PB: predicated region body
PF: predicated region fallthrough
CT: control target
= control target key end

     0   :  { %10 = vsyncpa [#allocation3], 0  ;;  %s4237_s0 = inlined_call_operand.hbm [shape: bf16[16,128], index: 0, kind: input, shape index: {}]   ;;  %s4238_s1 = inlined_call_operand.hbm [shape: bf16[128,2048], index: 1, kind: input, shape index: {}]   ;;  %s4239_s2 = inlined_call_operand.hbm [shape: f32[1,2048], index: 2, kind: input, shape index: {}]   ;;  %s4240_s3 = inlined_call_operand.hbm [shape: bf16[2048,128], index: 3, kind: input, shape index: {}]   ;;  %s4241_s4 = inlined_call_operand.vmem [shape: f32[1,128], index: 4, kind: input, shape index: {}]   ;;  %s4242_s5 = inlined_call_operand.hbm [shape: f32[16,128], index: 5, kind: output, shape index: {}]  }
   0x1   :  { %11 = vsyncpa [#allocation6], 0 }
   0x2   :  { %12 = vsyncpa [#allocation9], 0  ;;  %s31_s20 = sshll.u32 %s4238_s1, 4  ;;  %s32_s20 = int_to_ptr.hbm [resolvable:$true] %s31_s20 }
   0x3   :  { %13 = vsyncpa [#allocation4], 0  ;;  %s4129_s21 = smov [#allocation5]   ;;  %s18_s25 = sshll.u32 %s4237_s0, 4  ;;  %s19_s25 = int_to_ptr.hbm [resolvable:$true] %s18_s25 }
   0x4   :  { %s33_s22 = sshll.u32 %s4129_s21, 4  ;;  %s4130_s26 = smov 1024   ;;  %s34_s22 = int_to_ptr.vmem [resolvable:$true] %s33_s22 }
   0x5   :  { %s4131_s27 = smov 64   ;;  %s4132_s28 = smov [#allocation2]  }
   0x6   :  { %39 = dma.hbm_to_vmem [thread:$0]  %s32_s20, 16384, %s34_s22, [#allocation6], %s4130_s26, %s4130_s26, %s4131_s27  }
   0x7   :  { %s20_s29 = sshll.u32 %s4132_s28, 4  ;;  %s45_s1 = sshll.u32 %s4239_s2, 4  ;;  %s21_s29 = int_to_ptr.vmem [resolvable:$true] %s20_s29  ;;  %s46_s1 = int_to_ptr.hbm [resolvable:$true] %s45_s1 }
   0x8   :  { %s4133_s7 = smov 4   ;;  %s4134_s8 = smov [#allocation7]  }
   0x9   :  { %26 = dma.hbm_to_vmem [thread:$0]  %s19_s25, 128, %s21_s29, [#allocation3], %s4131_s27, %s4131_s27, %s4133_s7  }
   0xa   :  { %s47_s9 = sshll.u32 %s4134_s8, 4  ;;  %s55_s0 = sshll.u32 %s4240_s3, 4  ;;  %s48_s9 = int_to_ptr.vmem [resolvable:$true] %s47_s9  ;;  %s56_s0 = int_to_ptr.hbm [resolvable:$true] %s55_s0 }
   0xb   :  { %50 = dma.hbm_to_vmem [thread:$0]  %s46_s1, 256, %s48_s9, [#allocation6]  }
   0xc   :  { %s4135_s12 = smov [#allocation8]  }
   0xd   :  { %s57_s13 = sshll.u32 %s4135_s12, 4  ;;  %s58_s13 = int_to_ptr.vmem [resolvable:$true] %s57_s13 }
   0xe   :  { %63 = dma.hbm_to_vmem [thread:$0]  %s56_s0, 16384, %s58_s13, [#allocation9], %s4131_s27, %s4131_s27, %s4133_s7  }
   0xf   :  { %4121 = dma.done.wait [#allocation3], 128  }
  0x10   :  { %4122 = vsyncadd [#allocation3], 4294967168 }
  0x11   :  { %4123 = dma.done.wait [#allocation6], 16640  }
  0x12   :  { %4124 = vsyncadd [#allocation6], 4294950656 }
  0x13   :  { %4125 = dma.done.wait [#allocation9], 16384  }
  0x14   :  { %4126 = vsyncadd [#allocation9], 4294950912  ;;  %v3155_v0 = vld [vmem:[#allocation5 + $0x380] sm:$0xf]  ;;  %v3842_v2 = vld [vmem:[#allocation5 + $0x384] sm:$0xf] }
  0x15   :  { %v3850_v1 = vld [vmem:[#allocation5 + $0x3bc] sm:$0xf0]  ;;  %v3157_v4 = vld [vmem:[#allocation5 + $0x3c0] sm:$0xf0]  ;;  %v3163_v5 = vld [vmem:[#allocation5 + $0x388] sm:$0xf] }
  0x16   :  { %v3156_v3 = vor.u32 %v3850_v1, %v3155_v0  ;;  %v3851_v6 = vld [vmem:[#allocation5 + $0x3c4] sm:$0xf0]  ;;  %v3160_v7 = vor.u32 %v3842_v2, %v3157_v4  ;;  %v3843_v9 = vld [vmem:[#allocation5 + $0x38c] sm:$0xf]  ;;  %v3091_v11 = vld [vmem:[#allocation5 + $0x300] sm:$0xf] }
  0x17   :  { %v3164_v8 = vor.u32 %v3851_v6, %v3163_v5  ;;  %v3165_v10 = vld [vmem:[#allocation5 + $0x3c8] sm:$0xf0]  ;;  %v3834_v13 = vld [vmem:[#allocation5 + $0x33c] sm:$0xf0]  ;;  %v3826_v14 = vld [vmem:[#allocation5 + $0x304] sm:$0xf] }
  0x18   :  { %858 = vmatpush.bf16.msra.mxu0 %v3156_v3  ;;  %v3168_v12 = vor.u32 %v3843_v9, %v3165_v10  ;;  %v3093_v15 = vld [vmem:[#allocation5 + $0x340] sm:$0xf0]  ;;  %872 = vmatpush.bf16.msra.mxu1 %v3160_v7  ;;  %v3092_v16 = vor.u32 %v3834_v13, %v3091_v11  ;;  %v3099_v18 = vld [vmem:[#allocation5 + $0x308] sm:$0xf]  ;;  %v3827_v20 = vld [vmem:[#allocation5 + $0x30c] sm:$0xf] }
  0x19   :  { %886 = vmatpush.bf16.msra.mxu2 %v3164_v8  ;;  %v3096_v17 = vor.u32 %v3826_v14, %v3093_v15  ;;  %v3835_v19 = vld [vmem:[#allocation5 + $0x344] sm:$0xf0]  ;;  %v3101_v22 = vld [vmem:[#allocation5 + $0x348] sm:$0xf0]  ;;  %v3027_v23 = vld [vmem:[#allocation5 + $0x280] sm:$0xf] }
  0x1a   :  { %900 = vmatpush.bf16.msra.mxu3 %v3168_v12  ;;  %v3100_v21 = vor.u32 %v3835_v19, %v3099_v18  ;;  %v3818_v24 = vld [vmem:[#allocation5 + $0x2bc] sm:$0xf0]  ;;  %v3104_v25 = vor.u32 %v3827_v20, %v3101_v22  ;;  %v3810_v26 = vld [vmem:[#allocation5 + $0x284] sm:$0xf]  ;;  %v3035_v28 = vld [vmem:[#allocation5 + $0x288] sm:$0xf] }
  0x1b   :  { %v3029_v27 = vld [vmem:[#allocation5 + $0x2c0] sm:$0xf0]  ;;  %v3028_v29 = vor.u32 %v3818_v24, %v3027_v23  ;;  %v3819_v30 = vld [vmem:[#allocation5 + $0x2c4] sm:$0xf0]  ;;  %v3811_v31 = vld [vmem:[#allocation5 + $0x28c] sm:$0xf] }
  0x1c   :  { %859 = vmatpush.bf16.msra.mxu0 %v3092_v16  ;;  %v3037_v32 = vld [vmem:[#allocation5 + $0x2c8] sm:$0xf0]  ;;  %873 = vmatpush.bf16.msra.mxu1 %v3096_v17  ;;  %v3032_v33 = vor.u32 %v3810_v26, %v3029_v27  ;;  %v3036_v34 = vor.u32 %v3819_v30, %v3035_v28  ;;  %v2963_v35 = vld [vmem:[#allocation5 + $0x200] sm:$0xf]  ;;  %v3794_v37 = vld [vmem:[#allocation5 + $0x204] sm:$0xf] }
  0x1d   :  { %887 = vmatpush.bf16.msra.mxu2 %v3100_v21  ;;  %v3802_v36 = vld [vmem:[#allocation5 + $0x23c] sm:$0xf0]  ;;  %v3040_v38 = vor.u32 %v3811_v31, %v3037_v32  ;;  %v2965_v39 = vld [vmem:[#allocation5 + $0x240] sm:$0xf0]  ;;  %v2971_v40 = vld [vmem:[#allocation5 + $0x208] sm:$0xf] }
  0x1e   :  { %901 = vmatpush.bf16.msra.mxu3 %v3104_v25  ;;  %v3803_v41 = vld [vmem:[#allocation5 + $0x244] sm:$0xf0]  ;;  %v3795_v42 = vld [vmem:[#allocation5 + $0x20c] sm:$0xf]  ;;  %v2964_v44 = vor.u32 %v3802_v36, %v2963_v35  ;;  %v2968_v45 = vor.u32 %v3794_v37, %v2965_v39  ;;  %v2899_v47 = vld [vmem:[#allocation5 + $0x180] sm:$0xf] }
  0x1f   :  { %v2973_v43 = vld [vmem:[#allocation5 + $0x248] sm:$0xf0]  ;;  %v2972_v46 = vor.u32 %v3803_v41, %v2971_v40  ;;  %v3786_v48 = vld [vmem:[#allocation5 + $0x1bc] sm:$0xf0]  ;;  %v3778_v49 = vld [vmem:[#allocation5 + $0x184] sm:$0xf] }
  0x20   :  { %860 = vmatpush.bf16.msra.mxu0 %v3028_v29  ;;  %874 = vmatpush.bf16.msra.mxu1 %v3032_v33  ;;  %v2976_v50 = vor.u32 %v3795_v42, %v2973_v43  ;;  %v2901_v51 = vld [vmem:[#allocation5 + $0x1c0] sm:$0xf0]  ;;  %v2907_v52 = vld [vmem:[#allocation5 + $0x188] sm:$0xf]  ;;  %v3779_v54 = vld [vmem:[#allocation5 + $0x18c] sm:$0xf]  ;;  %v2900_v56 = vor.u32 %v3786_v48, %v2899_v47 }
  0x21   :  { %888 = vmatpush.bf16.msra.mxu2 %v3036_v34  ;;  %v3787_v53 = vld [vmem:[#allocation5 + $0x1c4] sm:$0xf0]  ;;  %v2909_v55 = vld [vmem:[#allocation5 + $0x1c8] sm:$0xf0]  ;;  %v2904_v57 = vor.u32 %v3778_v49, %v2901_v51  ;;  %v2835_v59 = vld [vmem:[#allocation5 + $0x100] sm:$0xf] }
  0x22   :  { %902 = vmatpush.bf16.msra.mxu3 %v3040_v38  ;;  %v2908_v58 = vor.u32 %v3787_v53, %v2907_v52  ;;  %v3770_v60 = vld [vmem:[#allocation5 + $0x13c] sm:$0xf0]  ;;  %v3762_v61 = vld [vmem:[#allocation5 + $0x104] sm:$0xf]  ;;  %v2912_v62 = vor.u32 %v3779_v54, %v2909_v55  ;;  %v2843_v0 = vld [vmem:[#allocation5 + $0x108] sm:$0xf] }
  0x23   :  { %v2837_v63 = vld [vmem:[#allocation5 + $0x140] sm:$0xf0]  ;;  %v3771_v1 = vld [vmem:[#allocation5 + $0x144] sm:$0xf0]  ;;  %v3763_v2 = vld [vmem:[#allocation5 + $0x10c] sm:$0xf]  ;;  %v2836_v4 = vor.u32 %v3770_v60, %v2835_v59 }
  0x24   :  { %861 = vmatpush.bf16.msra.mxu0 %v2964_v44  ;;  %875 = vmatpush.bf16.msra.mxu1 %v2968_v45  ;;  %v2845_v3 = vld [vmem:[#allocation5 + $0x148] sm:$0xf0]  ;;  %v2840_v5 = vor.u32 %v3762_v61, %v2837_v63  ;;  %v2844_v6 = vor.u32 %v3771_v1, %v2843_v0  ;;  %v2771_v7 = vld [vmem:[#allocation5 + $0x80] sm:$0xf]  ;;  %v3746_v9 = vld [vmem:[#allocation5 + $0x84] sm:$0xf] }
  0x25   :  { %889 = vmatpush.bf16.msra.mxu2 %v2972_v46  ;;  %v3754_v8 = vld [vmem:[#allocation5 + $0xbc] sm:$0xf0]  ;;  %v2848_v10 = vor.u32 %v3763_v2, %v2845_v3  ;;  %v2773_v11 = vld [vmem:[#allocation5 + $0xc0] sm:$0xf0]  ;;  %v2779_v12 = vld [vmem:[#allocation5 + $0x88] sm:$0xf] }
  0x26   :  { %903 = vmatpush.bf16.msra.mxu3 %v2976_v50  ;;  %v3755_v13 = vld [vmem:[#allocation5 + $0xc4] sm:$0xf0]  ;;  %v3747_v14 = vld [vmem:[#allocation5 + $0x8c] sm:$0xf]  ;;  %v2772_v16 = vor.u32 %v3754_v8, %v2771_v7  ;;  %v2707_v17 = vld [vmem:[#allocation5] sm:$0xf]  ;;  %v2776_v19 = vor.u32 %v3746_v9, %v2773_v11 }
  0x27   :  { %v2781_v15 = vld [vmem:[#allocation5 + $0xc8] sm:$0xf0]  ;;  %v3738_v18 = vld [vmem:[#allocation5 + $0x3c] sm:$0xf0]  ;;  %v2780_v20 = vor.u32 %v3755_v13, %v2779_v12  ;;  %v3730_v21 = vld [vmem:[#allocation5 + $0x4] sm:$0xf] }
  0x28   :  { %862 = vmatpush.bf16.msra.mxu0 %v2900_v56  ;;  %876 = vmatpush.bf16.msra.mxu1 %v2904_v57  ;;  %v2709_v22 = vld [vmem:[#allocation5 + $0x40] sm:$0xf0]  ;;  %v2715_v23 = vld [vmem:[#allocation5 + $0x8] sm:$0xf]  ;;  %v2784_v24 = vor.u32 %v3747_v14, %v2781_v15  ;;  %v3731_v26 = vld [vmem:[#allocation5 + $0xc] sm:$0xf]  ;;  %v2708_v31 = vor.u32 %v3738_v18, %v2707_v17 }
  0x29   :  { %890 = vmatpush.bf16.msra.mxu2 %v2908_v58  ;;  %v3739_v25 = vld [vmem:[#allocation5 + $0x44] sm:$0xf0]  ;;  %v2717_v27 = vld [vmem:[#allocation5 + $0x48] sm:$0xf0]  ;;  %v3171_v28 = vld [vmem:[#allocation5 + $0x390] sm:$0xf]  ;;  %v2712_v35 = vor.u32 %v3730_v21, %v2709_v22 }
  0x2a   :  { %904 = vmatpush.bf16.msra.mxu3 %v2912_v62  ;;  %v3852_v29 = vld [vmem:[#allocation5 + $0x3cc] sm:$0xf0]  ;;  %v3844_v30 = vld [vmem:[#allocation5 + $0x394] sm:$0xf]  ;;  %v3179_v33 = vld [vmem:[#allocation5 + $0x398] sm:$0xf]  ;;  %v2716_v36 = vor.u32 %v3739_v25, %v2715_v23  ;;  %v2720_v39 = vor.u32 %v3731_v26, %v2717_v27 }
  0x2b   :  { %v3173_v32 = vld [vmem:[#allocation5 + $0x3d0] sm:$0xf0]  ;;  %v3853_v34 = vld [vmem:[#allocation5 + $0x3d4] sm:$0xf0]  ;;  %v3845_v37 = vld [vmem:[#allocation5 + $0x39c] sm:$0xf]  ;;  %v3172_v40 = vor.u32 %v3852_v29, %v3171_v28 }
  0x2c   :  { %863 = vmatpush.bf16.msra.mxu0 %v2836_v4  ;;  %877 = vmatpush.bf16.msra.mxu1 %v2840_v5  ;;  %v3181_v38 = vld [vmem:[#allocation5 + $0x3d8] sm:$0xf0]  ;;  %v3107_v41 = vld [vmem:[#allocation5 + $0x310] sm:$0xf]  ;;  %v3176_v42 = vor.u32 %v3844_v30, %v3173_v32  ;;  %v3180_v43 = vor.u32 %v3853_v34, %v3179_v33  ;;  %v3828_v45 = vld [vmem:[#allocation5 + $0x314] sm:$0xf] }
  0x2d   :  { %891 = vmatpush.bf16.msra.mxu2 %v2844_v6  ;;  %v3836_v44 = vld [vmem:[#allocation5 + $0x34c] sm:$0xf0]  ;;  %v3109_v46 = vld [vmem:[#allocation5 + $0x350] sm:$0xf0]  ;;  %v3184_v47 = vor.u32 %v3845_v37, %v3181_v38  ;;  %v3115_v48 = vld [vmem:[#allocation5 + $0x318] sm:$0xf] }
  0x2e   :  { %905 = vmatpush.bf16.msra.mxu3 %v2848_v10  ;;  %v3837_v49 = vld [vmem:[#allocation5 + $0x354] sm:$0xf0]  ;;  %v3829_v51 = vld [vmem:[#allocation5 + $0x31c] sm:$0xf]  ;;  %v3108_v53 = vor.u32 %v3836_v44, %v3107_v41  ;;  %v3112_v54 = vor.u32 %v3828_v45, %v3109_v46  ;;  %v3043_v56 = vld [vmem:[#allocation5 + $0x290] sm:$0xf] }
  0x2f   :  { %v4181_v50 = vld [vmem:[#allocation2] sm:$0xff]  ;;  %v3116_v55 = vor.u32 %v3837_v49, %v3115_v48  ;;  %v3820_v57 = vld [vmem:[#allocation5 + $0x2cc] sm:$0xf0]  ;;  %v3812_v58 = vld [vmem:[#allocation5 + $0x294] sm:$0xf]  ;;  %s2686_s17 = sshll.u32 %s4242_s5, 4  ;;  %s2687_s17 = int_to_ptr.hbm [resolvable:$true] %s2686_s17 }
  0x30   :  { %864 = vmatpush.bf16.msra.mxu0 %v2772_v16  ;;  %878 = vmatpush.bf16.msra.mxu1 %v2776_v19  ;;  %v3117_v52 = vld [vmem:[#allocation5 + $0x358] sm:$0xf0]  ;;  %v3045_v60 = vld [vmem:[#allocation5 + $0x2d0] sm:$0xf0]  ;;  %v3051_v61 = vld [vmem:[#allocation5 + $0x298] sm:$0xf]  ;;  %v3044_v1 = vor.u32 %v3820_v57, %v3043_v56 }
  0x31   :  { %892 = vmatpush.bf16.msra.mxu2 %v2780_v20  ;;  %v3120_v59 = vor.u32 %v3829_v51, %v3117_v52  ;;  %v3821_v62 = vld [vmem:[#allocation5 + $0x2d4] sm:$0xf0]  ;;  %v3813_v63 = vld [vmem:[#allocation5 + $0x29c] sm:$0xf]  ;;  %v3048_v2 = vor.u32 %v3812_v58, %v3045_v60  ;;  %v2979_v4 = vld [vmem:[#allocation5 + $0x210] sm:$0xf] }
  0x32   :  { %906 = vmatpush.bf16.msra.mxu3 %v2784_v24  ;;  %v3053_v0 = vld [vmem:[#allocation5 + $0x2d8] sm:$0xf0]  ;;  %v3052_v3 = vor.u32 %v3821_v62, %v3051_v61  ;;  %v3804_v5 = vld [vmem:[#allocation5 + $0x24c] sm:$0xf0]  ;;  %v3796_v6 = vld [vmem:[#allocation5 + $0x214] sm:$0xf] }
  0x33   :  { %v3056_v7 = vor.u32 %v3813_v63, %v3053_v0  ;;  %v2981_v8 = vld [vmem:[#allocation5 + $0x250] sm:$0xf0]  ;;  %v2987_v9 = vld [vmem:[#allocation5 + $0x218] sm:$0xf]  ;;  %v3797_v11 = vld [vmem:[#allocation5 + $0x21c] sm:$0xf]  ;;  %v2980_v13 = vor.u32 %v3804_v5, %v2979_v4 }
  0x34   :  { %865 = vmatpush.bf16.msra.mxu0 %v2708_v31  ;;  %879 = vmatpush.bf16.msra.mxu1 %v2712_v35  ;;  %v3805_v10 = vld [vmem:[#allocation5 + $0x254] sm:$0xf0]  ;;  %v2989_v12 = vld [vmem:[#allocation5 + $0x258] sm:$0xf0]  ;;  %v2984_v14 = vor.u32 %v3796_v6, %v2981_v8  ;;  %v2915_v16 = vld [vmem:[#allocation5 + $0x190] sm:$0xf] }
  0x35   :  { %893 = vmatpush.bf16.msra.mxu2 %v2716_v36  ;;  %v2988_v15 = vor.u32 %v3805_v10, %v2987_v9  ;;  %v3788_v17 = vld [vmem:[#allocation5 + $0x1cc] sm:$0xf0]  ;;  %v3780_v18 = vld [vmem:[#allocation5 + $0x194] sm:$0xf]  ;;  %v2992_v19 = vor.u32 %v3797_v11, %v2989_v12  ;;  %v2923_v21 = vld [vmem:[#allocation5 + $0x198] sm:$0xf] }
  0x36   :  { %907 = vmatpush.bf16.msra.mxu3 %v2720_v39  ;;  %v2917_v20 = vld [vmem:[#allocation5 + $0x1d0] sm:$0xf0]  ;;  %v3789_v22 = vld [vmem:[#allocation5 + $0x1d4] sm:$0xf0]  ;;  %v3781_v23 = vld [vmem:[#allocation5 + $0x19c] sm:$0xf]  ;;  %v2916_v25 = vor.u32 %v3788_v17, %v2915_v16 }
  0x37   :  { %866 = vmatmul.bf16.vlgmr.msra.gmra.mxu0 %v4181_v50  ;;  %880 = vmatmul.bf16.vlgmr.msra.gmra.mxu1 %v4181_v50  ;;  %v2925_v24 = vld [vmem:[#allocation5 + $0x1d8] sm:$0xf0]  ;;  %v2920_v26 = vor.u32 %v3780_v18, %v2917_v20  ;;  %v2924_v27 = vor.u32 %v3789_v22, %v2923_v21  ;;  %v2851_v28 = vld [vmem:[#allocation5 + $0x110] sm:$0xf]  ;;  %v3764_v30 = vld [vmem:[#allocation5 + $0x114] sm:$0xf] }
  0x38   :  { %914 = vmatpush.bf16.msrb.mxu0 %v3172_v40  ;;  %928 = vmatpush.bf16.msrb.mxu1 %v3176_v42  ;;  %v3772_v29 = vld [vmem:[#allocation5 + $0x14c] sm:$0xf0]  ;;  %v2928_v31 = vor.u32 %v3781_v23, %v2925_v24  ;;  %v2853_v32 = vld [vmem:[#allocation5 + $0x150] sm:$0xf0]  ;;  %v2859_v33 = vld [vmem:[#allocation5 + $0x118] sm:$0xf] }
  0x39   :  { %942 = vmatpush.bf16.msrb.mxu2 %v3180_v43  ;;  %908 = vmatmul.bf16.vlgmr.msra.gmra.mxu3 %v4181_v50  ;;  %v3773_v34 = vld [vmem:[#allocation5 + $0x154] sm:$0xf0]  ;;  %v3765_v35 = vld [vmem:[#allocation5 + $0x11c] sm:$0xf]  ;;  %v2852_v37 = vor.u32 %v3772_v29, %v2851_v28  ;;  %v2856_v38 = vor.u32 %v3764_v30, %v2853_v32  ;;  %v2787_v40 = vld [vmem:[#allocation5 + $0x90] sm:$0xf] }
  0x3a   :  { %956 = vmatpush.bf16.msrb.mxu3 %v3184_v47  ;;  %894 = vmatmul.bf16.vlgmr.msra.gmra.mxu2 %v4181_v50  ;;  %v2861_v36 = vld [vmem:[#allocation5 + $0x158] sm:$0xf0]  ;;  %v2860_v39 = vor.u32 %v3773_v34, %v2859_v33  ;;  %v3756_v41 = vld [vmem:[#allocation5 + $0xcc] sm:$0xf0]  ;;  %v3748_v42 = vld [vmem:[#allocation5 + $0x94] sm:$0xf] }
  0x3b   :  { %v2864_v43 = vor.u32 %v3765_v35, %v2861_v36  ;;  %v2789_v44 = vld [vmem:[#allocation5 + $0xd0] sm:$0xf0]  ;;  %v2795_v45 = vld [vmem:[#allocation5 + $0x98] sm:$0xf]  ;;  %v3749_v47 = vld [vmem:[#allocation5 + $0x9c] sm:$0xf]  ;;  %v2788_v49 = vor.u32 %v3756_v41, %v2787_v40 }
  0x3c   :  { %915 = vmatpush.bf16.msrb.mxu0 %v3108_v53  ;;  %929 = vmatpush.bf16.msrb.mxu1 %v3112_v54  ;;  %v3757_v46 = vld [vmem:[#allocation5 + $0xd4] sm:$0xf0]  ;;  %v2797_v48 = vld [vmem:[#allocation5 + $0xd8] sm:$0xf0]  ;;  %v2723_v51 = vld [vmem:[#allocation5 + $0x10] sm:$0xf]  ;;  %v2792_v53 = vor.u32 %v3748_v42, %v2789_v44 }
  0x3d   :  { %943 = vmatpush.bf16.msrb.mxu2 %v3116_v55  ;;  %v3740_v52 = vld [vmem:[#allocation5 + $0x4c] sm:$0xf0]  ;;  %v2796_v54 = vor.u32 %v3757_v46, %v2795_v45  ;;  %v3732_v55 = vld [vmem:[#allocation5 + $0x14] sm:$0xf]  ;;  %v2731_v57 = vld [vmem:[#allocation5 + $0x18] sm:$0xf]  ;;  %v2800_v58 = vor.u32 %v3749_v47, %v2797_v48 }
  0x3e   :  { %957 = vmatpush.bf16.msrb.mxu3 %v3120_v59  ;;  %v2725_v56 = vld [vmem:[#allocation5 + $0x50] sm:$0xf0]  ;;  %v3741_v59 = vld [vmem:[#allocation5 + $0x54] sm:$0xf0]  ;;  %v3733_v60 = vld [vmem:[#allocation5 + $0x1c] sm:$0xf] }
  0x3f   :  { %v2733_v61 = vld [vmem:[#allocation5 + $0x58] sm:$0xf0]  ;;  %v3187_v62 = vld [vmem:[#allocation5 + $0x3a0] sm:$0xf]  ;;  %v3846_v0 = vld [vmem:[#allocation5 + $0x3a4] sm:$0xf]  ;;  %v2728_v5 = vor.u32 %v3732_v55, %v2725_v56  ;;  %v2732_v6 = vor.u32 %v3741_v59, %v2731_v57 }
  0x40   :  { %916 = vmatpush.bf16.msrb.mxu0 %v3044_v1  ;;  %930 = vmatpush.bf16.msrb.mxu1 %v3048_v2  ;;  %v3854_v63 = vld [vmem:[#allocation5 + $0x3dc] sm:$0xf0]  ;;  %v2724_v1 = vor.u32 %v3740_v52, %v2723_v51  ;;  %v3189_v2 = vld [vmem:[#allocation5 + $0x3e0] sm:$0xf0]  ;;  %v3855_v4 = vld [vmem:[#allocation5 + $0x3e4] sm:$0xf0]  ;;  %v2736_v9 = vor.u32 %v3733_v60, %v2733_v61 }
  0x41   :  { %944 = vmatpush.bf16.msrb.mxu2 %v3052_v3  ;;  %v3195_v3 = vld [vmem:[#allocation5 + $0x3a8] sm:$0xf]  ;;  %v3197_v8 = vld [vmem:[#allocation5 + $0x3e8] sm:$0xf0]  ;;  %v3188_v10 = vor.u32 %v3854_v63, %v3187_v62  ;;  %v3192_v11 = vor.u32 %v3846_v0, %v3189_v2  ;;  %v3125_v17 = vld [vmem:[#allocation5 + $0x360] sm:$0xf0] }
  0x42   :  { %958 = vmatpush.bf16.msrb.mxu3 %v3056_v7  ;;  %v3847_v7 = vld [vmem:[#allocation5 + $0x3ac] sm:$0xf]  ;;  %v3196_v12 = vor.u32 %v3855_v4, %v3195_v3  ;;  %v3131_v18 = vld [vmem:[#allocation5 + $0x328] sm:$0xf]  ;;  %v3061_v29 = vld [vmem:[#allocation5 + $0x2e0] sm:$0xf0] }
  0x43   :  { %v3200_v16 = vor.u32 %v3847_v7, %v3197_v8  ;;  %v3831_v20 = vld [vmem:[#allocation5 + $0x32c] sm:$0xf]  ;;  %v3067_v30 = vld [vmem:[#allocation5 + $0x2a8] sm:$0xf]  ;;  %v2997_v41 = vld [vmem:[#allocation5 + $0x260] sm:$0xf0] }
  0x44   :  { %917 = vmatpush.bf16.msrb.mxu0 %v2980_v13  ;;  %931 = vmatpush.bf16.msrb.mxu1 %v2984_v14  ;;  %v3123_v13 = vld [vmem:[#allocation5 + $0x320] sm:$0xf]  ;;  %v3133_v21 = vld [vmem:[#allocation5 + $0x368] sm:$0xf0]  ;;  %v3003_v42 = vld [vmem:[#allocation5 + $0x228] sm:$0xf] }
  0x45   :  { %945 = vmatpush.bf16.msrb.mxu2 %v2988_v15  ;;  %v3838_v14 = vld [vmem:[#allocation5 + $0x35c] sm:$0xf0]  ;;  %v3830_v15 = vld [vmem:[#allocation5 + $0x324] sm:$0xf]  ;;  %v3136_v28 = vor.u32 %v3831_v20, %v3133_v21  ;;  %v3815_v32 = vld [vmem:[#allocation5 + $0x2ac] sm:$0xf] }
  0x46   :  { %959 = vmatpush.bf16.msrb.mxu3 %v2992_v19  ;;  %v3839_v19 = vld [vmem:[#allocation5 + $0x364] sm:$0xf0]  ;;  %v3124_v22 = vor.u32 %v3838_v14, %v3123_v13  ;;  %v3128_v23 = vor.u32 %v3830_v15, %v3125_v17  ;;  %v3069_v33 = vld [vmem:[#allocation5 + $0x2e8] sm:$0xf0]  ;;  %v3790_v51 = vld [vmem:[#allocation5 + $0x1dc] sm:$0xf0] }
  0x47   :  { %v3132_v24 = vor.u32 %v3839_v19, %v3131_v18  ;;  %v3072_v40 = vor.u32 %v3815_v32, %v3069_v33  ;;  %v3799_v44 = vld [vmem:[#allocation5 + $0x22c] sm:$0xf]  ;;  %v3782_v52 = vld [vmem:[#allocation5 + $0x1a4] sm:$0xf]  ;;  %v2939_v55 = vld [vmem:[#allocation5 + $0x1a8] sm:$0xf] }
  0x48   :  { %918 = vmatpush.bf16.msrb.mxu0 %v2916_v25  ;;  %932 = vmatpush.bf16.msrb.mxu1 %v2920_v26  ;;  %v3059_v25 = vld [vmem:[#allocation5 + $0x2a0] sm:$0xf]  ;;  %v3005_v45 = vld [vmem:[#allocation5 + $0x268] sm:$0xf0]  ;;  %v3791_v56 = vld [vmem:[#allocation5 + $0x1e4] sm:$0xf0] }
  0x49   :  { %946 = vmatpush.bf16.msrb.mxu2 %v2924_v27  ;;  %v3822_v26 = vld [vmem:[#allocation5 + $0x2dc] sm:$0xf0]  ;;  %v3814_v27 = vld [vmem:[#allocation5 + $0x2a4] sm:$0xf]  ;;  %v3783_v57 = vld [vmem:[#allocation5 + $0x1ac] sm:$0xf]  ;;  %v2940_v61 = vor.u32 %v3791_v56, %v2939_v55 }
  0x4a   :  { %960 = vmatpush.bf16.msrb.mxu3 %v2928_v31  ;;  %v3823_v31 = vld [vmem:[#allocation5 + $0x2e4] sm:$0xf0]  ;;  %v3060_v34 = vor.u32 %v3822_v26, %v3059_v25  ;;  %v3064_v35 = vor.u32 %v3814_v27, %v3061_v29  ;;  %v2867_v62 = vld [vmem:[#allocation5 + $0x120] sm:$0xf]  ;;  %v3766_v0 = vld [vmem:[#allocation5 + $0x124] sm:$0xf] }
  0x4b   :  { %v3068_v36 = vor.u32 %v3823_v31, %v3067_v30  ;;  %v3774_v63 = vld [vmem:[#allocation5 + $0x15c] sm:$0xf0]  ;;  %v2869_v2 = vld [vmem:[#allocation5 + $0x160] sm:$0xf0]  ;;  %v2875_v3 = vld [vmem:[#allocation5 + $0x128] sm:$0xf] }
  0x4c   :  { %919 = vmatpush.bf16.msrb.mxu0 %v2852_v37  ;;  %933 = vmatpush.bf16.msrb.mxu1 %v2856_v38  ;;  %v2995_v37 = vld [vmem:[#allocation5 + $0x220] sm:$0xf]  ;;  %v3775_v4 = vld [vmem:[#allocation5 + $0x164] sm:$0xf0]  ;;  %v2868_v7 = vor.u32 %v3774_v63, %v2867_v62  ;;  %v2872_v8 = vor.u32 %v3766_v0, %v2869_v2  ;;  %v2805_v14 = vld [vmem:[#allocation5 + $0xe0] sm:$0xf0] }
  0x4d   :  { %947 = vmatpush.bf16.msrb.mxu2 %v2860_v39  ;;  %v3806_v38 = vld [vmem:[#allocation5 + $0x25c] sm:$0xf0]  ;;  %v3798_v39 = vld [vmem:[#allocation5 + $0x224] sm:$0xf]  ;;  %v2811_v15 = vld [vmem:[#allocation5 + $0xa8] sm:$0xf] }
  0x4e   :  { %961 = vmatpush.bf16.msrb.mxu3 %v2864_v43  ;;  %v3807_v43 = vld [vmem:[#allocation5 + $0x264] sm:$0xf0]  ;;  %v2996_v46 = vor.u32 %v3806_v38, %v2995_v37  ;;  %v3000_v47 = vor.u32 %v3798_v39, %v2997_v41  ;;  %v3751_v17 = vld [vmem:[#allocation5 + $0xac] sm:$0xf]  ;;  %v2739_v20 = vld [vmem:[#allocation5 + $0x20] sm:$0xf] }
  0x4f   :  { %v3004_v48 = vor.u32 %v3807_v43, %v3003_v42  ;;  %v2813_v18 = vld [vmem:[#allocation5 + $0xe8] sm:$0xf0]  ;;  %v3742_v21 = vld [vmem:[#allocation5 + $0x5c] sm:$0xf0]  ;;  %v2741_v25 = vld [vmem:[#allocation5 + $0x60] sm:$0xf0] }
  0x50   :  { %920 = vmatpush.bf16.msrb.mxu0 %v2788_v49  ;;  %934 = vmatpush.bf16.msrb.mxu1 %v2792_v53  ;;  %v2931_v49 = vld [vmem:[#allocation5 + $0x1a0] sm:$0xf]  ;;  %v3008_v53 = vor.u32 %v3799_v44, %v3005_v45  ;;  %v2747_v26 = vld [vmem:[#allocation5 + $0x28] sm:$0xf]  ;;  %v2816_v27 = vor.u32 %v3751_v17, %v2813_v18  ;;  %v3735_v29 = vld [vmem:[#allocation5 + $0x2c] sm:$0xf] }
  0x51   :  { %948 = vmatpush.bf16.msrb.mxu2 %v2796_v54  ;;  %v2933_v54 = vld [vmem:[#allocation5 + $0x1e0] sm:$0xf0]  ;;  %v2932_v59 = vor.u32 %v3790_v51, %v2931_v49  ;;  %v2749_v30 = vld [vmem:[#allocation5 + $0x68] sm:$0xf0]  ;;  %v3203_v31 = vld [vmem:[#allocation5 + $0x3b0] sm:$0xf] }
  0x52   :  { %962 = vmatpush.bf16.msrb.mxu3 %v2800_v58  ;;  %v2941_v58 = vld [vmem:[#allocation5 + $0x1e8] sm:$0xf0]  ;;  %v2936_v60 = vor.u32 %v3782_v52, %v2933_v54  ;;  %v3856_v32 = vld [vmem:[#allocation5 + $0x3ec] sm:$0xf0]  ;;  %v3848_v33 = vld [vmem:[#allocation5 + $0x3b4] sm:$0xf]  ;;  %v2752_v42 = vor.u32 %v3735_v29, %v2749_v30 }
  0x53   :  { %v3857_v37 = vld [vmem:[#allocation5 + $0x3f4] sm:$0xf0]  ;;  %v3213_v41 = vld [vmem:[#allocation5 + $0x3f8] sm:$0xf0]  ;;  %v3204_v43 = vor.u32 %v3856_v32, %v3203_v31  ;;  %v3141_v51 = vld [vmem:[#allocation5 + $0x370] sm:$0xf0] }
  0x54   :  { %921 = vmatpush.bf16.msrb.mxu0 %v2724_v1  ;;  %935 = vmatpush.bf16.msrb.mxu1 %v2728_v5  ;;  %v2944_v1 = vor.u32 %v3783_v57, %v2941_v58  ;;  %v3767_v5 = vld [vmem:[#allocation5 + $0x12c] sm:$0xf]  ;;  %v3147_v52 = vld [vmem:[#allocation5 + $0x338] sm:$0xf]  ;;  %v3833_v54 = vld [vmem:[#allocation5 + $0x33c] sm:$0xf] }
  0x55   :  { %949 = vmatpush.bf16.msrb.mxu2 %v2732_v6  ;;  %v2877_v6 = vld [vmem:[#allocation5 + $0x168] sm:$0xf0]  ;;  %v3149_v55 = vld [vmem:[#allocation5 + $0x378] sm:$0xf0]  ;;  %v3077_v63 = vld [vmem:[#allocation5 + $0x2f0] sm:$0xf0] }
  0x56   :  { %963 = vmatpush.bf16.msrb.mxu3 %v2736_v9  ;;  %v2876_v9 = vor.u32 %v3775_v4, %v2875_v3  ;;  %v2880_v13 = vor.u32 %v3767_v5, %v2877_v6  ;;  %v3152_v62 = vor.u32 %v3833_v54, %v3149_v55  ;;  %v3083_v0 = vld [vmem:[#allocation5 + $0x2b8] sm:$0xf]  ;;  %v3817_v2 = vld [vmem:[#allocation5 + $0x2bc] sm:$0xf]  ;;  %v2883_v31 = vld [vmem:[#allocation5 + $0x130] sm:$0xf] }
  0x57   :  { %922 = vmatmul.bf16.vlgmr.msrb.gmra.mxu0 %v4181_v50  ;;  %936 = vmatmul.bf16.vlgmr.msrb.gmra.mxu1 %v4181_v50  ;;  %v3085_v3 = vld [vmem:[#allocation5 + $0x2f8] sm:$0xf0]  ;;  %v3776_v32 = vld [vmem:[#allocation5 + $0x16c] sm:$0xf0]  ;;  %s4137_s18 = smov 128   ;;  %s4138_s19 = smov 8  }
  0x58   :  { %970 = vmatpush.bf16.msra.mxu0 %v3188_v10  ;;  %984 = vmatpush.bf16.msra.mxu1 %v3192_v11  ;;  %v2803_v10 = vld [vmem:[#allocation5 + $0xa0] sm:$0xf] }
  0x59   :  { %998 = vmatpush.bf16.msra.mxu2 %v3196_v12  ;;  %964 = vmatmul.bf16.vlgmr.msrb.gmra.mxu3 %v4181_v50  ;;  %v3758_v11 = vld [vmem:[#allocation5 + $0xdc] sm:$0xf0]  ;;  %v3750_v12 = vld [vmem:[#allocation5 + $0xa4] sm:$0xf] }
  0x5a   :  { %1012 = vmatpush.bf16.msra.mxu3 %v3200_v16  ;;  %950 = vmatmul.bf16.vlgmr.msrb.gmra.mxu2 %v4181_v50  ;;  %v3759_v16 = vld [vmem:[#allocation5 + $0xe4] sm:$0xf0]  ;;  %v2804_v19 = vor.u32 %v3758_v11, %v2803_v10  ;;  %v3088_v10 = vor.u32 %v3817_v2, %v3085_v3  ;;  %v3013_v11 = vld [vmem:[#allocation5 + $0x270] sm:$0xf0] }
  0x5c   :  { %971 = vmatpush.bf16.msra.mxu0 %v3124_v22  ;;  %985 = vmatpush.bf16.msra.mxu1 %v3128_v23  ;;  %v2808_v22 = vor.u32 %v3750_v12, %v2805_v14  ;;  %v2812_v23 = vor.u32 %v3759_v16, %v2811_v15  ;;  %v3019_v12 = vld [vmem:[#allocation5 + $0x238] sm:$0xf]  ;;  %v3801_v14 = vld [vmem:[#allocation5 + $0x23c] sm:$0xf] }
  0x5d   :  { %999 = vmatpush.bf16.msra.mxu2 %v3132_v24  ;;  %v3734_v24 = vld [vmem:[#allocation5 + $0x24] sm:$0xf]  ;;  %v3021_v15 = vld [vmem:[#allocation5 + $0x278] sm:$0xf0] }
  0x5e   :  { %1013 = vmatpush.bf16.msra.mxu3 %v3136_v28  ;;  %v3743_v28 = vld [vmem:[#allocation5 + $0x64] sm:$0xf0]  ;;  %v2744_v38 = vor.u32 %v3734_v24, %v2741_v25  ;;  %v2955_v24 = vld [vmem:[#allocation5 + $0x1b8] sm:$0xf] }
  0x5f   :  { %v2748_v39 = vor.u32 %v3743_v28, %v2747_v26  ;;  %v3793_v25 = vld [vmem:[#allocation5 + $0x1f4] sm:$0xf0]  ;;  %v3785_v26 = vld [vmem:[#allocation5 + $0x1bc] sm:$0xf] }
  0x60   :  { %972 = vmatpush.bf16.msra.mxu0 %v3060_v34  ;;  %986 = vmatpush.bf16.msra.mxu1 %v3064_v35  ;;  %v2740_v34 = vor.u32 %v3742_v21, %v2739_v20  ;;  %v3205_v35 = vld [vmem:[#allocation5 + $0x3f0] sm:$0xf0]  ;;  %v3792_v20 = vld [vmem:[#allocation5 + $0x1ec] sm:$0xf0]  ;;  %v2956_v30 = vor.u32 %v3793_v25, %v2955_v24  ;;  %v3885_v24 = vld [vmem:[#allocation8 + $0xd8] sm:$0xff] }
  0x61   :  { %1000 = vmatpush.bf16.msra.mxu2 %v3068_v36  ;;  %v3211_v36 = vld [vmem:[#allocation5 + $0x3b8] sm:$0xf]  ;;  %v3208_v44 = vor.u32 %v3848_v33, %v3205_v35  ;;  %v3784_v21 = vld [vmem:[#allocation5 + $0x1b4] sm:$0xf]  ;;  %v3868_v25 = vld [vmem:[#allocation8 + $0x50] sm:$0xff] }
  0x62   :  { %1014 = vmatpush.bf16.msra.mxu3 %v3072_v40  ;;  %v3849_v40 = vld [vmem:[#allocation5 + $0x3bc] sm:$0xf]  ;;  %v3212_v45 = vor.u32 %v3857_v37, %v3211_v36  ;;  %v3768_v33 = vld [vmem:[#allocation5 + $0x134] sm:$0xf]  ;;  %v2891_v36 = vld [vmem:[#allocation5 + $0x138] sm:$0xf] }
  0x63   :  { %v3216_v49 = vor.u32 %v3849_v40, %v3213_v41  ;;  %v2885_v35 = vld [vmem:[#allocation5 + $0x170] sm:$0xf0]  ;;  %v3777_v37 = vld [vmem:[#allocation5 + $0x174] sm:$0xf0]  ;;  %v2884_v40 = vor.u32 %v3776_v32, %v2883_v31  ;;  %v3884_v31 = vld [vmem:[#allocation8 + $0xd0] sm:$0xff] }
  0x64   :  { %973 = vmatpush.bf16.msra.mxu0 %v2996_v46  ;;  %987 = vmatpush.bf16.msra.mxu1 %v3000_v47  ;;  %v3139_v46 = vld [vmem:[#allocation5 + $0x330] sm:$0xf]  ;;  %v2888_v41 = vor.u32 %v3768_v33, %v2885_v35  ;;  %v3867_v32 = vld [vmem:[#allocation8 + $0x48] sm:$0xff] }
  0x65   :  { %1001 = vmatpush.bf16.msra.mxu2 %v3004_v48  ;;  %v3840_v47 = vld [vmem:[#allocation5 + $0x36c] sm:$0xf0]  ;;  %v3832_v48 = vld [vmem:[#allocation5 + $0x334] sm:$0xf]  ;;  %v3875_v33 = vld [vmem:[#allocation8 + $0x88] sm:$0xff] }
  0x66   :  { %1015 = vmatpush.bf16.msra.mxu3 %v3008_v53  ;;  %v3841_v53 = vld [vmem:[#allocation5 + $0x374] sm:$0xf0]  ;;  %v3140_v56 = vor.u32 %v3840_v47, %v3139_v46  ;;  %v3144_v57 = vor.u32 %v3832_v48, %v3141_v51  ;;  %v2821_v47 = vld [vmem:[#allocation5 + $0xf0] sm:$0xf0]  ;;  %v3753_v51 = vld [vmem:[#allocation5 + $0xbc] sm:$0xf] }
  0x67   :  { %v3148_v58 = vor.u32 %v3841_v53, %v3147_v52  ;;  %v2827_v48 = vld [vmem:[#allocation5 + $0xb8] sm:$0xf]  ;;  %v2829_v52 = vld [vmem:[#allocation5 + $0xf8] sm:$0xf0]  ;;  %v3858_v35 = vld [vmem:[#allocation8] sm:$0xff] }
  0x68   :  { %974 = vmatpush.bf16.msra.mxu0 %v2932_v59  ;;  %988 = vmatpush.bf16.msra.mxu1 %v2936_v60  ;;  %v3075_v59 = vld [vmem:[#allocation5 + $0x2b0] sm:$0xf] }
  0x69   :  { %1002 = vmatpush.bf16.msra.mxu2 %v2940_v61  ;;  %v3824_v60 = vld [vmem:[#allocation5 + $0x2ec] sm:$0xf0]  ;;  %v3816_v61 = vld [vmem:[#allocation5 + $0x2b4] sm:$0xf] }
  0x6a   :  { %1016 = vmatpush.bf16.msra.mxu3 %v2944_v1  ;;  %v3825_v1 = vld [vmem:[#allocation5 + $0x2f4] sm:$0xf0]  ;;  %v3076_v4 = vor.u32 %v3824_v60, %v3075_v59  ;;  %v3080_v5 = vor.u32 %v3816_v61, %v3077_v63  ;;  %v2832_v59 = vor.u32 %v3753_v51, %v2829_v52  ;;  %v2757_v60 = vld [vmem:[#allocation5 + $0x70] sm:$0xf0]  ;;  %v3737_v63 = vld [vmem:[#allocation5 + $0x3c] sm:$0xf] }
  0x6b   :  { %v3084_v6 = vor.u32 %v3825_v1, %v3083_v0  ;;  %v2763_v61 = vld [vmem:[#allocation5 + $0x38] sm:$0xf]  ;;  %v2765_v0 = vld [vmem:[#allocation5 + $0x78] sm:$0xf0]  ;;  %v3904_v51 = vld [vmem:[#allocation8 + $0x170] sm:$0xff] }
  0x6c   :  { %975 = vmatpush.bf16.msra.mxu0 %v2868_v7  ;;  %989 = vmatpush.bf16.msra.mxu1 %v2872_v8  ;;  %v3011_v7 = vld [vmem:[#allocation5 + $0x230] sm:$0xf] }
  0x6d   :  { %1003 = vmatpush.bf16.msra.mxu2 %v2876_v9  ;;  %v3808_v8 = vld [vmem:[#allocation5 + $0x26c] sm:$0xf0]  ;;  %v3800_v9 = vld [vmem:[#allocation5 + $0x234] sm:$0xf] }
  0x6e   :  { %1017 = vmatpush.bf16.msra.mxu3 %v2880_v13  ;;  %v3809_v13 = vld [vmem:[#allocation5 + $0x274] sm:$0xf0]  ;;  %v3012_v16 = vor.u32 %v3808_v8, %v3011_v7  ;;  %v3016_v17 = vor.u32 %v3800_v9, %v3013_v11  ;;  %v3881_v7 = vld [vmem:[#allocation8 + $0xb8] sm:$0xff]  ;;  %v3864_v8 = vld [vmem:[#allocation8 + $0x30] sm:$0xff] }
  0x6f   :  { %v3020_v18 = vor.u32 %v3809_v13, %v3019_v12  ;;  %v3889_v9 = vld [vmem:[#allocation8 + $0xf8] sm:$0xff]  ;;  %v3880_v11 = vld [vmem:[#allocation8 + $0xb0] sm:$0xff]  ;;  %v3863_v12 = vld [vmem:[#allocation8 + $0x28] sm:$0xff] }
  0x70   :  { %976 = vmatpush.bf16.msra.mxu0 %v2804_v19  ;;  %990 = vmatpush.bf16.msra.mxu1 %v2808_v22  ;;  %v2947_v19 = vld [vmem:[#allocation5 + $0x1b0] sm:$0xf]  ;;  %v3024_v22 = vor.u32 %v3801_v14, %v3021_v15  ;;  %v3888_v13 = vld [vmem:[#allocation8 + $0xf0] sm:$0xff]  ;;  %v3871_v14 = vld [vmem:[#allocation8 + $0x68] sm:$0xff] }
  0x71   :  { %1004 = vmatpush.bf16.msra.mxu2 %v2812_v23  ;;  %v2949_v23 = vld [vmem:[#allocation5 + $0x1f0] sm:$0xf0]  ;;  %v2948_v28 = vor.u32 %v3792_v20, %v2947_v19  ;;  %v3879_v15 = vld [vmem:[#allocation8 + $0xa8] sm:$0xff] }
  0x72   :  { %1018 = vmatpush.bf16.msra.mxu3 %v2816_v27  ;;  %v2957_v27 = vld [vmem:[#allocation5 + $0x1f8] sm:$0xf0]  ;;  %v2952_v29 = vor.u32 %v3784_v21, %v2949_v23  ;;  %v3878_v19 = vld [vmem:[#allocation8 + $0xa0] sm:$0xff]  ;;  %v3869_v21 = vld [vmem:[#allocation8 + $0x58] sm:$0xff] }
  0x73   :  { %v3886_v20 = vld [vmem:[#allocation8 + $0xe0] sm:$0xff]  ;;  %v3860_v23 = vld [vmem:[#allocation8 + $0x10] sm:$0xff] }
  0x74   :  { %977 = vmatpush.bf16.msra.mxu0 %v2740_v34  ;;  %991 = vmatpush.bf16.msra.mxu1 %v2744_v38  ;;  %v2960_v34 = vor.u32 %v3785_v26, %v2957_v27  ;;  %v3769_v38 = vld [vmem:[#allocation5 + $0x13c] sm:$0xf]  ;;  %v4199_v26 = vld [vmem:[#allocation7] sm:$0xff] }
  0x75   :  { %1005 = vmatpush.bf16.msra.mxu2 %v2748_v39  ;;  %v2893_v39 = vld [vmem:[#allocation5 + $0x178] sm:$0xf0]  ;;  %v3876_v27 = vld [vmem:[#allocation8 + $0x90] sm:$0xff] }
  0x76   :  { %1019 = vmatpush.bf16.msra.mxu3 %v2752_v42  ;;  %v2892_v42 = vor.u32 %v3777_v37, %v2891_v36  ;;  %v2896_v46 = vor.u32 %v3769_v38, %v2893_v39  ;;  %v3883_v36 = vld [vmem:[#allocation8 + $0xc8] sm:$0xff]  ;;  %v1104_v37 = vperm.slane %v4199_v26, 2  ;;  %v1105_v38 = vperm.slane %v4199_v26, 3  ;;  %v3866_v39 = vld [vmem:[#allocation8 + $0x40] sm:$0xff] }
  0x77   :  { %978 = vmatmul.bf16.vlgmr.msra.gmra.mxu0 %v4181_v50  ;;  %992 = vmatmul.bf16.vlgmr.msra.gmra.mxu1 %v4181_v50 }
  0x78   :  { %1026 = vmatpush.bf16.msrb.mxu0 %v3204_v43  ;;  %1040 = vmatpush.bf16.msrb.mxu1 %v3208_v44  ;;  %v2819_v43 = vld [vmem:[#allocation5 + $0xb0] sm:$0xf] }
  0x79   :  { %1054 = vmatpush.bf16.msrb.mxu2 %v3212_v45  ;;  %1020 = vmatmul.bf16.vlgmr.msra.gmra.mxu3 %v4181_v50  ;;  %v3760_v44 = vld [vmem:[#allocation5 + $0xec] sm:$0xf0]  ;;  %v3752_v45 = vld [vmem:[#allocation5 + $0xb4] sm:$0xf] }
  0x7a   :  { %1068 = vmatpush.bf16.msrb.mxu3 %v3216_v49  ;;  %1006 = vmatmul.bf16.vlgmr.msra.gmra.mxu2 %v4181_v50  ;;  %v3761_v49 = vld [vmem:[#allocation5 + $0xf4] sm:$0xf0]  ;;  %v2820_v53 = vor.u32 %v3760_v44, %v2819_v43  ;;  %v2824_v54 = vor.u32 %v3752_v45, %v2821_v47  ;;  %v3882_v45 = vld [vmem:[#allocation8 + $0xc0] sm:$0xff]  ;;  %v3896_v47 = vld [vmem:[#allocation8 + $0x130] sm:$0xff] }
  0x7b   :  { %v2828_v55 = vor.u32 %v3761_v49, %v2827_v48  ;;  %v3913_v48 = vld [vmem:[#allocation8 + $0x1b8] sm:$0xff] }
  0x7c   :  { %1027 = vmatpush.bf16.msrb.mxu0 %v3140_v56  ;;  %1041 = vmatpush.bf16.msrb.mxu1 %v3144_v57  ;;  %v2755_v56 = vld [vmem:[#allocation5 + $0x30] sm:$0xf]  ;;  %v3921_v49 = vld [vmem:[#allocation8 + $0x1f8] sm:$0xff] }
  0x7d   :  { %1055 = vmatpush.bf16.msrb.mxu2 %v3148_v58  ;;  %v3744_v57 = vld [vmem:[#allocation5 + $0x6c] sm:$0xf0]  ;;  %v3736_v58 = vld [vmem:[#allocation5 + $0x34] sm:$0xf] }
  0x7e   :  { %1069 = vmatpush.bf16.msrb.mxu3 %v3152_v62  ;;  %v3745_v62 = vld [vmem:[#allocation5 + $0x74] sm:$0xf0]  ;;  %v2756_v1 = vor.u32 %v3744_v57, %v2755_v56  ;;  %v2760_v2 = vor.u32 %v3736_v58, %v2757_v60  ;;  %v3920_v58 = vld [vmem:[#allocation8 + $0x1f0] sm:$0xff] }
  0x7f   :  { %v2764_v3 = vor.u32 %v3745_v62, %v2763_v61  ;;  %v3895_v57 = vld [vmem:[#allocation8 + $0x128] sm:$0xff] }
  0x80   :  { %1028 = vmatpush.bf16.msrb.mxu0 %v3076_v4  ;;  %1042 = vmatpush.bf16.msrb.mxu1 %v3080_v5  ;;  %v2768_v4 = vor.u32 %v3737_v63, %v2765_v0  ;;  %v3865_v5 = vld [vmem:[#allocation8 + $0x38] sm:$0xff]  ;;  %v3894_v0 = vld [vmem:[#allocation8 + $0x120] sm:$0xff] }
  0x81   :  { %1056 = vmatpush.bf16.msrb.mxu2 %v3084_v6  ;;  %v3873_v6 = vld [vmem:[#allocation8 + $0x78] sm:$0xff] }
  0x82   :  { %1070 = vmatpush.bf16.msrb.mxu3 %v3088_v10  ;;  %v3872_v10 = vld [vmem:[#allocation8 + $0x70] sm:$0xff] }
  0x84   :  { %1029 = vmatpush.bf16.msrb.mxu0 %v3012_v16  ;;  %1043 = vmatpush.bf16.msrb.mxu1 %v3016_v17  ;;  %v3862_v16 = vld [vmem:[#allocation8 + $0x20] sm:$0xff]  ;;  %v3887_v17 = vld [vmem:[#allocation8 + $0xe8] sm:$0xff] }
  0x85   :  { %1057 = vmatpush.bf16.msrb.mxu2 %v3020_v18  ;;  %v3870_v18 = vld [vmem:[#allocation8 + $0x60] sm:$0xff] }
  0x86   :  { %1071 = vmatpush.bf16.msrb.mxu3 %v3024_v22  ;;  %v3877_v22 = vld [vmem:[#allocation8 + $0x98] sm:$0xff] }
  0x88   :  { %1030 = vmatpush.bf16.msrb.mxu0 %v2948_v28  ;;  %1044 = vmatpush.bf16.msrb.mxu1 %v2952_v29  ;;  %v3859_v28 = vld [vmem:[#allocation8 + $0x8] sm:$0xff]  ;;  %v1102_v29 = vperm.slane %v4199_v26, 0 }
  0x89   :  { %1058 = vmatpush.bf16.msrb.mxu2 %v2956_v30  ;;  %v1103_v30 = vperm.slane %v4199_v26, 1 }
  0x8a   :  { %1072 = vmatpush.bf16.msrb.mxu3 %v2960_v34 }
  0x8b   :  { %v1134_v34 = vpack.c.bf16 %v1103_v30, %v1102_v29  ;;  %v1106_v30 = vperm.slane %v4199_v26, 4 }
  0x8c   :  { %1031 = vmatpush.bf16.msrb.mxu0 %v2884_v40  ;;  %1045 = vmatpush.bf16.msrb.mxu1 %v2888_v41  ;;  %v3897_v40 = vld [vmem:[#allocation8 + $0x138] sm:$0xff] }
  0x8d   :  { %1059 = vmatpush.bf16.msrb.mxu2 %v2892_v42  ;;  %v3905_v41 = vld [vmem:[#allocation8 + $0x178] sm:$0xff]  ;;  %v3874_v42 = vld [vmem:[#allocation8 + $0x80] sm:$0xff]  ;;  %v1150_v43 = vunpack.c.l.b16 %v1134_v34  ;;  %v1151_v44 = vunpack.c.h.b16 %v1134_v34 }
  0x8e   :  { %1073 = vmatpush.bf16.msrb.mxu3 %v2896_v46  ;;  %v1135_v46 = vpack.c.bf16 %v1105_v38, %v1104_v37 }
  0x8f   :  { %v1166_v52 = vpack.c.b16 %v1150_v43, %v1150_v43  ;;  %v3908_v43 = vld [vmem:[#allocation8 + $0x190] sm:$0xff] }
  0x90   :  { %1032 = vmatpush.bf16.msrb.mxu0 %v2820_v53  ;;  %1046 = vmatpush.bf16.msrb.mxu1 %v2824_v54  ;;  %v1167_v53 = vpack.c.b16 %v1151_v44, %v1151_v44  ;;  %v3912_v54 = vld [vmem:[#allocation8 + $0x1b0] sm:$0xff]  ;;  %v1153_v56 = vunpack.c.h.b16 %v1135_v46 }
  0x91   :  { %1060 = vmatpush.bf16.msrb.mxu2 %v2828_v55  ;;  %v1152_v55 = vunpack.c.l.b16 %v1135_v46  ;;  %v1183_v60 = vpack.i.b16 %v1166_v52, %v1166_v52  ;;  %v3916_v44 = vld [vmem:[#allocation8 + $0x1d0] sm:$0xff] }
  0x92   :  { %1074 = vmatpush.bf16.msrb.mxu3 %v2832_v59  ;;  %v3903_v59 = vld [vmem:[#allocation8 + $0x168] sm:$0xff]  ;;  %v1187_v61 = vpack.i.b16 %v1167_v53, %v1167_v53  ;;  %v1169_v63 = vpack.c.b16 %v1153_v56, %v1153_v56  ;;  %v3890_v56 = vld [vmem:[#allocation8 + $0x100] sm:$0xff] }
  0x93   :  { %v1168_v62 = vpack.c.b16 %v1152_v55, %v1152_v55 }
  0x94   :  { %1033 = vmatpush.bf16.msrb.mxu0 %v2756_v1  ;;  %1047 = vmatpush.bf16.msrb.mxu1 %v2760_v2  ;;  %v3902_v2 = vld [vmem:[#allocation8 + $0x160] sm:$0xff] }
  0x95   :  { %1061 = vmatpush.bf16.msrb.mxu2 %v2764_v3  ;;  %v3911_v3 = vld [vmem:[#allocation8 + $0x1a8] sm:$0xff] }
  0x96   :  { %1075 = vmatpush.bf16.msrb.mxu3 %v2768_v4  ;;  %v3919_v4 = vld [vmem:[#allocation8 + $0x1e8] sm:$0xff] }
  0x97   :  { %1034 = vmatmul.bf16.vlgmr.msrb.gmra.mxu0 %v4181_v50  ;;  %1048 = vmatmul.bf16.vlgmr.msrb.gmra.mxu1 %v4181_v50 }
  0x98   :  { %2450 = vmatpush.bf16.msra.mxu0 %v3865_v5  ;;  %2464 = vmatpush.bf16.msra.mxu1 %v3873_v6 }
  0x99   :  { %1062 = vmatmul.bf16.vlgmr.msrb.gmra.mxu2 %v4181_v50  ;;  %1076 = vmatmul.bf16.vlgmr.msrb.gmra.mxu3 %v4181_v50  ;;  %v3861_v50 = vld [vmem:[#allocation8 + $0x18] sm:$0xff] }
  0x9a   :  { %2478 = vmatpush.bf16.msra.mxu2 %v3881_v7  ;;  %2492 = vmatpush.bf16.msra.mxu3 %v3889_v9  ;;  %v1185_v7 = vperm.slane %v1183_v60, 0  ;;  %v1191_v9 = vpack.i.b16 %v1168_v62, %v1168_v62 }
  0x9c   :  { %2451 = vmatpush.bf16.msra.mxu0 %v3864_v8  ;;  %2465 = vmatpush.bf16.msra.mxu1 %v3872_v10  ;;  %v1189_v8 = vperm.slane %v1187_v61, 0  ;;  %v1195_v10 = vpack.i.b16 %v1169_v63, %v1169_v63 }
  0x9e   :  { %2479 = vmatpush.bf16.msra.mxu2 %v3880_v11  ;;  %2493 = vmatpush.bf16.msra.mxu3 %v3888_v13  ;;  %v3893_v11 = vld [vmem:[#allocation8 + $0x118] sm:$0xff]  ;;  %v3910_v13 = vld [vmem:[#allocation8 + $0x1a0] sm:$0xff] }
  0xa0   :  { %2452 = vmatpush.bf16.msra.mxu0 %v3863_v12  ;;  %2466 = vmatpush.bf16.msra.mxu1 %v3871_v14  ;;  %v3901_v12 = vld [vmem:[#allocation8 + $0x158] sm:$0xff]  ;;  %v3918_v14 = vld [vmem:[#allocation8 + $0x1e0] sm:$0xff] }
  0xa2   :  { %2480 = vmatpush.bf16.msra.mxu2 %v3879_v15  ;;  %2494 = vmatpush.bf16.msra.mxu3 %v3887_v17 }
  0xa4   :  { %2453 = vmatpush.bf16.msra.mxu0 %v3862_v16  ;;  %2467 = vmatpush.bf16.msra.mxu1 %v3870_v18  ;;  %v1278_v18 = vunpack.c.l.bf16 %v1185_v7  ;;  %v3915_v7 = vld [vmem:[#allocation8 + $0x1c8] sm:$0xff] }
  0xa6   :  { %2481 = vmatpush.bf16.msra.mxu2 %v3878_v19  ;;  %2495 = vmatpush.bf16.msra.mxu3 %v3886_v20  ;;  %v1279_v19 = vunpack.c.l.bf16 %v1189_v8 }
  0xa8   :  { %2454 = vmatpush.bf16.msra.mxu0 %v3861_v50  ;;  %2468 = vmatpush.bf16.msra.mxu1 %v3869_v21  ;;  %v4205_v21 = vperm.slane %v1191_v9, 0 }
  0xaa   :  { %2482 = vmatpush.bf16.msra.mxu2 %v3877_v22  ;;  %2496 = vmatpush.bf16.msra.mxu3 %v3885_v24  ;;  %v4207_v22 = vperm.slane %v1195_v10, 0  ;;  %v1280_v37 = vunpack.c.l.bf16 %v4205_v21  ;;  %v3945_v21 = vld [vmem:[#allocation8 + $0x2b8] sm:$0xff] }
  0xac   :  { %2455 = vmatpush.bf16.msra.mxu0 %v3860_v23  ;;  %2469 = vmatpush.bf16.msra.mxu1 %v3868_v25  ;;  %v3892_v23 = vld [vmem:[#allocation8 + $0x110] sm:$0xff]  ;;  %v1281_v38 = vunpack.c.l.bf16 %v4207_v22  ;;  %v3953_v22 = vld [vmem:[#allocation8 + $0x2f8] sm:$0xff] }
  0xad   :  { %v3900_v25 = vld [vmem:[#allocation8 + $0x150] sm:$0xff] }
  0xae   :  { %2483 = vmatpush.bf16.msra.mxu2 %v3876_v27  ;;  %2497 = vmatpush.bf16.msra.mxu3 %v3884_v31  ;;  %v3909_v27 = vld [vmem:[#allocation8 + $0x198] sm:$0xff]  ;;  %v1107_v31 = vperm.slane %v4199_v26, 5 }
  0xb0   :  { %2456 = vmatpush.bf16.msra.mxu0 %v3859_v28  ;;  %2470 = vmatpush.bf16.msra.mxu1 %v3867_v32  ;;  %v3917_v28 = vld [vmem:[#allocation8 + $0x1d8] sm:$0xff]  ;;  %v1136_v46 = vpack.c.bf16 %v1107_v31, %v1106_v30  ;;  %v3944_v30 = vld [vmem:[#allocation8 + $0x2b0] sm:$0xff] }
  0xb1   :  { %v3952_v31 = vld [vmem:[#allocation8 + $0x2f0] sm:$0xff] }
  0xb2   :  { %2484 = vmatpush.bf16.msra.mxu2 %v3875_v33  ;;  %2498 = vmatpush.bf16.msra.mxu3 %v3883_v36  ;;  %v1154_v62 = vunpack.c.l.b16 %v1136_v46  ;;  %v1155_v63 = vunpack.c.h.b16 %v1136_v46  ;;  %v3933_v46 = vld [vmem:[#allocation8 + $0x258] sm:$0xff] }
  0xb4   :  { %2457 = vmatpush.bf16.msra.mxu0 %v3858_v35  ;;  %2471 = vmatpush.bf16.msra.mxu1 %v3866_v39  ;;  %v867_v1 = vpop.f32.mrf.mxu0  ;;  %v881_v5 = vpop.f32.mrf.mxu1  ;;  %v3891_v39 = vld [vmem:[#allocation8 + $0x108] sm:$0xff] }
  0xb5   :  { %v1082_v6 = vpack.c.bf16 %v881_v5, %v867_v1  ;;  %v3929_v1 = vld [vmem:[#allocation8 + $0x238] sm:$0xff]  ;;  %v1109_v5 = vperm.slane %v4199_v26, 7 }
  0xb6   :  { %2485 = vmatpush.bf16.msra.mxu2 %v3874_v42  ;;  %2499 = vmatpush.bf16.msra.mxu3 %v3882_v45  ;;  %v3899_v42 = vld [vmem:[#allocation8 + $0x148] sm:$0xff] }
  0xb7   :  { %v1246_v16 = vunpack.c.l.bf16 %v1082_v6  ;;  %v1247_v17 = vunpack.c.h.bf16 %v1082_v6  ;;  %v3937_v6 = vld [vmem:[#allocation8 + $0x278] sm:$0xff] }
  0xb8   :  { %2506 = vmatpush.bf16.msrb.mxu0 %v3897_v40  ;;  %2520 = vmatpush.bf16.msrb.mxu1 %v3905_v41 }
  0xb9   :  { %v1294_v32 = vadd.f32 %v1278_v18, %v1246_v16  ;;  %v1295_v33 = vadd.f32 %v1279_v19, %v1247_v17  ;;  %v3928_v16 = vld [vmem:[#allocation8 + $0x230] sm:$0xff] }
  0xba   :  { %2534 = vmatpush.bf16.msrb.mxu2 %v3913_v48  ;;  %2548 = vmatpush.bf16.msrb.mxu3 %v3921_v49 }
  0xbb   :  { %v1375_v48 = vmax.f32 %v1295_v33, 0.0 }
  0xbc   :  { %2507 = vmatpush.bf16.msrb.mxu0 %v3896_v47  ;;  %2521 = vmatpush.bf16.msrb.mxu1 %v3904_v51  ;;  %v909_v50 = vpop.f32.mrf.mxu3  ;;  %v869_v24 = vpop.f32.mrf.mxu0  ;;  %v1374_v47 = vmax.f32 %v1294_v32, 0.0 }
  0xbd   :  { %v895_v15 = vpop.f32.mrf.mxu2  ;;  %v883_v29 = vpop.f32.mrf.mxu1 }
  0xbe   :  { %2535 = vmatpush.bf16.msrb.mxu2 %v3912_v54  ;;  %2549 = vmatpush.bf16.msrb.mxu3 %v3920_v58  ;;  %v1083_v20 = vpack.c.bf16 %v909_v50, %v895_v15  ;;  %v1090_v34 = vpack.c.bf16 %v883_v29, %v869_v24  ;;  %v1171_v50 = vpack.c.b16 %v1155_v63, %v1155_v63  ;;  %v3932_v63 = vld [vmem:[#allocation8 + $0x250] sm:$0xff] }
  0xc0   :  { %2508 = vmatpush.bf16.msrb.mxu0 %v3895_v57  ;;  %2522 = vmatpush.bf16.msrb.mxu1 %v3903_v59  ;;  %v1248_v35 = vunpack.c.l.bf16 %v1083_v20  ;;  %v1249_v36 = vunpack.c.h.bf16 %v1083_v20  ;;  %v1262_v40 = vunpack.c.l.bf16 %v1090_v34  ;;  %v1263_v41 = vunpack.c.h.bf16 %v1090_v34  ;;  %v3907_v59 = vld [vmem:[#allocation8 + $0x188] sm:$0xff]  ;;  %v3914_v20 = vld [vmem:[#allocation8 + $0x1c0] sm:$0xff] }
  0xc1   :  { %v1203_v29 = vpack.i.b16 %v1171_v50, %v1171_v50  ;;  %v3948_v50 = vld [vmem:[#allocation8 + $0x2d0] sm:$0xff] }
  0xc2   :  { %2536 = vmatpush.bf16.msrb.mxu2 %v3911_v3  ;;  %2550 = vmatpush.bf16.msrb.mxu3 %v3919_v4  ;;  %v1310_v49 = vadd.f32 %v1278_v18, %v1262_v40  ;;  %v1311_v51 = vadd.f32 %v1279_v19, %v1263_v41  ;;  %v1296_v53 = vadd.f32 %v1280_v37, %v1248_v35  ;;  %v1108_v4 = vperm.slane %v4199_v26, 6  ;;  %v3936_v26 = vld [vmem:[#allocation8 + $0x270] sm:$0xff]  ;;  %v3943_v41 = vld [vmem:[#allocation8 + $0x2a8] sm:$0xff] }
  0xc3   :  { %v1297_v54 = vadd.f32 %v1281_v38, %v1249_v36  ;;  %v1170_v19 = vpack.c.b16 %v1154_v62, %v1154_v62  ;;  %v3926_v36 = vld [vmem:[#allocation8 + $0x220] sm:$0xff]  ;;  %v1205_v40 = vperm.slane %v1203_v29, 0  ;;  %v3924_v62 = vld [vmem:[#allocation8 + $0x210] sm:$0xff] }
  0xc4   :  { %2509 = vmatpush.bf16.msrb.mxu0 %v3894_v0  ;;  %2523 = vmatpush.bf16.msrb.mxu1 %v3902_v2  ;;  %v911_v52 = vpop.f32.mrf.mxu3  ;;  %v1390_v57 = vmax.f32 %v1310_v49, 0.0  ;;  %v1391_v58 = vmax.f32 %v1311_v51, 0.0  ;;  %v3898_v0 = vld [vmem:[#allocation8 + $0x140] sm:$0xff]  ;;  %v1376_v8 = vmax.f32 %v1296_v53, 0.0  ;;  %v1137_v15 = vpack.c.bf16 %v1109_v5, %v1108_v4  ;;  %v3949_v4 = vld [vmem:[#allocation8 + $0x2d8] sm:$0xff] }
  0xc5   :  { %v897_v45 = vpop.f32.mrf.mxu2  ;;  %v1377_v9 = vmax.f32 %v1297_v54, 0.0  ;;  %v1283_v51 = vunpack.c.l.bf16 %v1205_v40  ;;  %v3950_v54 = vld [vmem:[#allocation8 + $0x2e0] sm:$0xff] }
  0xc6   :  { %2537 = vmatpush.bf16.msrb.mxu2 %v3910_v13  ;;  %2551 = vmatpush.bf16.msrb.mxu3 %v3918_v14  ;;  %v1091_v55 = vpack.c.bf16 %v911_v52, %v897_v45  ;;  %v1406_v2 = vpack.c.bf16 %v1390_v57, %v1374_v47  ;;  %v1407_v3 = vpack.c.bf16 %v1391_v58, %v1375_v48  ;;  %v1157_v24 = vunpack.c.h.b16 %v1137_v15  ;;  %v3925_v45 = vld [vmem:[#allocation8 + $0x218] sm:$0xff]  ;;  %v3942_v52 = vld [vmem:[#allocation8 + $0x2a0] sm:$0xff] }
  0xc7   :  { %v3930_v29 = vld [vmem:[#allocation8 + $0x240] sm:$0xff] }
  0xc8   :  { %2510 = vmatpush.bf16.msrb.mxu0 %v3893_v11  ;;  %2524 = vmatpush.bf16.msrb.mxu1 %v3901_v12  ;;  %v1264_v60 = vunpack.c.l.bf16 %v1091_v55  ;;  %v1265_v61 = vunpack.c.h.bf16 %v1091_v55  ;;  %v3906_v12 = vld [vmem:[#allocation8 + $0x180] sm:$0xff]  ;;  %v1173_v35 = vpack.c.b16 %v1157_v24, %v1157_v24 }
  0xc9   :  { %2458 = vmatmul.bf16.vlgmr.msra.gmra.mxu0 %v1406_v2  ;;  %2472 = vmatmul.bf16.vlgmr.msra.gmra.mxu1 %v1407_v3  ;;  %v3941_v3 = vld [vmem:[#allocation8 + $0x298] sm:$0xff] }
  0xca   :  { %2538 = vmatpush.bf16.msrb.mxu2 %v3909_v27  ;;  %2552 = vmatpush.bf16.msrb.mxu3 %v3917_v28  ;;  %v1312_v10 = vadd.f32 %v1280_v37, %v1264_v60  ;;  %v1313_v11 = vadd.f32 %v1281_v38, %v1265_v61  ;;  %v3935_v27 = vld [vmem:[#allocation8 + $0x268] sm:$0xff]  ;;  %v1199_v28 = vpack.i.b16 %v1170_v19, %v1170_v19  ;;  %v3934_v37 = vld [vmem:[#allocation8 + $0x260] sm:$0xff]  ;;  %v4219_v61 = vld [vmem:[#allocation7 + $0x8] sm:$0xff] }
  0xcc   :  { %2511 = vmatpush.bf16.msrb.mxu0 %v3892_v23  ;;  %2525 = vmatpush.bf16.msrb.mxu1 %v3900_v25  ;;  %v1392_v13 = vmax.f32 %v1312_v10, 0.0  ;;  %v1393_v14 = vmax.f32 %v1313_v11, 0.0  ;;  %v1156_v23 = vunpack.c.l.b16 %v1137_v15  ;;  %v3927_v25 = vld [vmem:[#allocation8 + $0x228] sm:$0xff] }
  0xce   :  { %2539 = vmatpush.bf16.msrb.mxu2 %v3908_v43  ;;  %2553 = vmatpush.bf16.msrb.mxu3 %v3916_v44  ;;  %v1408_v17 = vpack.c.bf16 %v1392_v13, %v1376_v8  ;;  %v1409_v18 = vpack.c.bf16 %v1393_v14, %v1377_v9  ;;  %v1172_v34 = vpack.c.b16 %v1156_v23, %v1156_v23  ;;  %v1111_v8 = vperm.slane %v4219_v61, 1  ;;  %v3923_v13 = vld [vmem:[#allocation8 + $0x208] sm:$0xff] }
  0xcf   :  { %v1211_v44 = vpack.i.b16 %v1173_v35, %v1173_v35  ;;  %v3931_v14 = vld [vmem:[#allocation8 + $0x248] sm:$0xff] }
  0xd0   :  { %2512 = vmatpush.bf16.msrb.mxu0 %v3891_v39  ;;  %2526 = vmatpush.bf16.msrb.mxu1 %v3899_v42  ;;  %v1201_v39 = vperm.slane %v1199_v28, 0  ;;  %v3951_v42 = vld [vmem:[#allocation8 + $0x2e8] sm:$0xff]  ;;  %v1207_v43 = vpack.i.b16 %v1172_v34, %v1172_v34  ;;  %v3922_v28 = vld [vmem:[#allocation8 + $0x200] sm:$0xff] }
  0xd1   :  { %2486 = vmatmul.bf16.vlgmr.msra.gmra.mxu2 %v1408_v17  ;;  %2500 = vmatmul.bf16.vlgmr.msra.gmra.mxu3 %v1409_v18  ;;  %v3940_v18 = vld [vmem:[#allocation8 + $0x290] sm:$0xff] }
  0xd2   :  { %2540 = vmatpush.bf16.msrb.mxu2 %v3907_v59  ;;  %2554 = vmatpush.bf16.msrb.mxu3 %v3915_v7  ;;  %v1282_v49 = vunpack.c.l.bf16 %v1201_v39  ;;  %v4215_v58 = vperm.slane %v1207_v43, 0  ;;  %v4217_v59 = vperm.slane %v1211_v44, 0  ;;  %v1110_v7 = vperm.slane %v4219_v61, 0  ;;  %v3947_v39 = vld [vmem:[#allocation8 + $0x2c8] sm:$0xff] }
  0xd4   :  { %2513 = vmatpush.bf16.msrb.mxu0 %v3890_v56  ;;  %2527 = vmatpush.bf16.msrb.mxu1 %v3898_v0  ;;  %v923_v32 = vpop.f32.mrf.mxu0  ;;  %v937_v33 = vpop.f32.mrf.mxu1  ;;  %v1284_v11 = vunpack.c.l.bf16 %v4215_v58  ;;  %v1138_v23 = vpack.c.bf16 %v1111_v8, %v1110_v7  ;;  %v3977_v58 = vld [vmem:[#allocation8 + $0x3b8] sm:$0xff]  ;;  %v3966_v7 = vld [vmem:[#allocation8 + $0x360] sm:$0xff] }
  0xd5   :  { %v1084_v38 = vpack.c.bf16 %v937_v33, %v923_v32  ;;  %v3961_v32 = vld [vmem:[#allocation8 + $0x338] sm:$0xff] }
  0xd6   :  { %2541 = vmatpush.bf16.msrb.mxu2 %v3906_v12  ;;  %2555 = vmatpush.bf16.msrb.mxu3 %v3914_v20  ;;  %v1285_v12 = vunpack.c.l.bf16 %v4217_v59  ;;  %v3969_v33 = vld [vmem:[#allocation8 + $0x378] sm:$0xff]  ;;  %v1158_v40 = vunpack.c.l.b16 %v1138_v23 }
  0xd7   :  { %v1250_v47 = vunpack.c.l.bf16 %v1084_v38  ;;  %v1251_v48 = vunpack.c.h.bf16 %v1084_v38  ;;  %v3939_v38 = vld [vmem:[#allocation8 + $0x288] sm:$0xff]  ;;  %v3985_v59 = vld [vmem:[#allocation8 + $0x3f8] sm:$0xff] }
  0xd8   :  { %2562 = vmatpush.bf16.msra.mxu0 %v3929_v1  ;;  %2576 = vmatpush.bf16.msra.mxu1 %v3937_v6 }
  0xd9   :  { %v1298_v0 = vadd.f32 %v1282_v49, %v1250_v47  ;;  %v1299_v1 = vadd.f32 %v1283_v51, %v1251_v48  ;;  %v3968_v47 = vld [vmem:[#allocation8 + $0x370] sm:$0xff] }
  0xda   :  { %2590 = vmatpush.bf16.msra.mxu2 %v3945_v21  ;;  %2604 = vmatpush.bf16.msra.mxu3 %v3953_v22 }
  0xdb   :  { %v1378_v15 = vmax.f32 %v1298_v0, 0.0 }
  0xdc   :  { %2563 = vmatpush.bf16.msra.mxu0 %v3928_v16  ;;  %2577 = vmatpush.bf16.msra.mxu1 %v3936_v26  ;;  %v965_v55 = vpop.f32.mrf.mxu3  ;;  %v925_v56 = vpop.f32.mrf.mxu0  ;;  %v1379_v16 = vmax.f32 %v1299_v1, 0.0 }
  0xdd   :  { %v951_v53 = vpop.f32.mrf.mxu2  ;;  %v939_v60 = vpop.f32.mrf.mxu1 }
  0xde   :  { %2591 = vmatpush.bf16.msra.mxu2 %v3944_v30  ;;  %2605 = vmatpush.bf16.msra.mxu3 %v3952_v31  ;;  %v1085_v57 = vpack.c.bf16 %v965_v55, %v951_v53  ;;  %v1092_v2 = vpack.c.bf16 %v939_v60, %v925_v56  ;;  %v3946_v55 = vld [vmem:[#allocation8 + $0x2c0] sm:$0xff]  ;;  %v3959_v60 = vld [vmem:[#allocation8 + $0x328] sm:$0xff] }
  0xe0   :  { %2564 = vmatpush.bf16.msra.mxu0 %v3927_v25  ;;  %2578 = vmatpush.bf16.msra.mxu1 %v3935_v27  ;;  %v1266_v5 = vunpack.c.l.bf16 %v1092_v2  ;;  %v1267_v6 = vunpack.c.h.bf16 %v1092_v2  ;;  %v1252_v9 = vunpack.c.l.bf16 %v1085_v57  ;;  %v1253_v10 = vunpack.c.h.bf16 %v1085_v57 }
  0xe2   :  { %2592 = vmatpush.bf16.msra.mxu2 %v3943_v41  ;;  %2606 = vmatpush.bf16.msra.mxu3 %v3951_v42  ;;  %v1314_v26 = vadd.f32 %v1282_v49, %v1266_v5  ;;  %v1315_v17 = vadd.f32 %v1283_v51, %v1267_v6  ;;  %v1300_v24 = vadd.f32 %v1284_v11, %v1252_v9  ;;  %v1159_v41 = vunpack.c.h.b16 %v1138_v23  ;;  %v3958_v6 = vld [vmem:[#allocation8 + $0x320] sm:$0xff] }
  0xe3   :  { %v1301_v25 = vadd.f32 %v1285_v12, %v1253_v10  ;;  %v3974_v23 = vld [vmem:[#allocation8 + $0x3a0] sm:$0xff] }
  0xe4   :  { %2565 = vmatpush.bf16.msra.mxu0 %v3926_v36  ;;  %2579 = vmatpush.bf16.msra.mxu1 %v3934_v37  ;;  %v1394_v20 = vmax.f32 %v1314_v26, 0.0  ;;  %v1395_v21 = vmax.f32 %v1315_v17, 0.0  ;;  %v967_v22 = vpop.f32.mrf.mxu3  ;;  %v1112_v36 = vperm.slane %v4219_v61, 2  ;;  %v1113_v37 = vperm.slane %v4219_v61, 3  ;;  %v3965_v26 = vld [vmem:[#allocation8 + $0x358] sm:$0xff] }
  0xe5   :  { %v953_v19 = vpop.f32.mrf.mxu2  ;;  %v1380_v42 = vmax.f32 %v1300_v24, 0.0  ;;  %v1381_v43 = vmax.f32 %v1301_v25, 0.0  ;;  %v1175_v53 = vpack.c.b16 %v1159_v41, %v1159_v41  ;;  %v3982_v24 = vld [vmem:[#allocation8 + $0x3e0] sm:$0xff] }
  0xe6   :  { %2593 = vmatpush.bf16.msra.mxu2 %v3942_v52  ;;  %2607 = vmatpush.bf16.msra.mxu3 %v3950_v54  ;;  %v1093_v27 = vpack.c.bf16 %v967_v22, %v953_v19  ;;  %v1410_v30 = vpack.c.bf16 %v1394_v20, %v1378_v15  ;;  %v1411_v31 = vpack.c.bf16 %v1395_v21, %v1379_v16  ;;  %v3938_v54 = vld [vmem:[#allocation8 + $0x280] sm:$0xff]  ;;  %v3983_v15 = vld [vmem:[#allocation8 + $0x3e8] sm:$0xff]  ;;  %v3957_v16 = vld [vmem:[#allocation8 + $0x318] sm:$0xff] }
  0xe7   :  { %v1139_v51 = vpack.c.bf16 %v1113_v37, %v1112_v36  ;;  %v1174_v52 = vpack.c.b16 %v1158_v40, %v1158_v40  ;;  %v1219_v2 = vpack.i.b16 %v1175_v53, %v1175_v53  ;;  %v1114_v37 = vperm.slane %v4219_v61, 4  ;;  %v3981_v40 = vld [vmem:[#allocation8 + $0x3d8] sm:$0xff] }
  0xe8   :  { %2566 = vmatpush.bf16.msra.mxu0 %v3925_v45  ;;  %2580 = vmatpush.bf16.msra.mxu1 %v3933_v46  ;;  %v1268_v34 = vunpack.c.l.bf16 %v1093_v27  ;;  %v1269_v35 = vunpack.c.h.bf16 %v1093_v27  ;;  %v3960_v46 = vld [vmem:[#allocation8 + $0x330] sm:$0xff] }
  0xe9   :  { %2514 = vmatmul.bf16.vlgmr.msrb.gmra.mxu0 %v1410_v30  ;;  %2528 = vmatmul.bf16.vlgmr.msrb.gmra.mxu1 %v1411_v31  ;;  %v1161_v0 = vunpack.c.h.b16 %v1139_v51  ;;  %v1215_v1 = vpack.i.b16 %v1174_v52, %v1174_v52 }
  0xea   :  { %2594 = vmatpush.bf16.msra.mxu2 %v3941_v3  ;;  %2608 = vmatpush.bf16.msra.mxu3 %v3949_v4  ;;  %v1316_v44 = vadd.f32 %v1284_v11, %v1268_v34  ;;  %v1317_v45 = vadd.f32 %v1285_v12, %v1269_v35  ;;  %v3976_v3 = vld [vmem:[#allocation8 + $0x3b0] sm:$0xff] }
  0xeb   :  { %v3984_v4 = vld [vmem:[#allocation8 + $0x3f0] sm:$0xff]  ;;  %v1177_v10 = vpack.c.b16 %v1161_v0, %v1161_v0  ;;  %v1217_v12 = vperm.slane %v1215_v1, 0  ;;  %v3954_v1 = vld [vmem:[#allocation8 + $0x300] sm:$0xff] }
  0xec   :  { %2567 = vmatpush.bf16.msra.mxu0 %v3924_v62  ;;  %2581 = vmatpush.bf16.msra.mxu1 %v3932_v63  ;;  %v1396_v48 = vmax.f32 %v1316_v44, 0.0  ;;  %v1397_v49 = vmax.f32 %v1317_v45, 0.0  ;;  %v3967_v62 = vld [vmem:[#allocation8 + $0x368] sm:$0xff]  ;;  %v1160_v63 = vunpack.c.l.b16 %v1139_v51 }
  0xed   :  { %v1286_v20 = vunpack.c.l.bf16 %v1217_v12  ;;  %v3963_v44 = vld [vmem:[#allocation8 + $0x348] sm:$0xff]  ;;  %v1117_v12 = vperm.slane %v4219_v61, 7 }
  0xee   :  { %2595 = vmatpush.bf16.msra.mxu2 %v3940_v18  ;;  %2609 = vmatpush.bf16.msra.mxu3 %v3948_v50  ;;  %v1412_v56 = vpack.c.bf16 %v1396_v48, %v1380_v42  ;;  %v1413_v57 = vpack.c.bf16 %v1397_v49, %v1381_v43  ;;  %v1176_v9 = vpack.c.b16 %v1160_v63, %v1160_v63  ;;  %v3955_v43 = vld [vmem:[#allocation8 + $0x308] sm:$0xff] }
  0xef   :  { %v1227_v18 = vpack.i.b16 %v1177_v10, %v1177_v10  ;;  %v3979_v10 = vld [vmem:[#allocation8 + $0x3c8] sm:$0xff] }
  0xf0   :  { %2568 = vmatpush.bf16.msra.mxu0 %v3923_v13  ;;  %2582 = vmatpush.bf16.msra.mxu1 %v3931_v14  ;;  %v1221_v13 = vperm.slane %v1219_v2, 0  ;;  %v3975_v14 = vld [vmem:[#allocation8 + $0x3a8] sm:$0xff]  ;;  %v1223_v17 = vpack.i.b16 %v1176_v9, %v1176_v9  ;;  %v3962_v2 = vld [vmem:[#allocation8 + $0x340] sm:$0xff] }
  0xf1   :  { %2542 = vmatmul.bf16.vlgmr.msrb.gmra.mxu2 %v1412_v56  ;;  %2556 = vmatmul.bf16.vlgmr.msrb.gmra.mxu3 %v1413_v57  ;;  %v3972_v56 = vld [vmem:[#allocation8 + $0x390] sm:$0xff]  ;;  %v3971_v9 = vld [vmem:[#allocation8 + $0x388] sm:$0xff] }
  0xf2   :  { %2596 = vmatpush.bf16.msra.mxu2 %v3939_v38  ;;  %2610 = vmatpush.bf16.msra.mxu3 %v3947_v39  ;;  %v1287_v21 = vunpack.c.l.bf16 %v1221_v13  ;;  %v1225_v31 = vperm.slane %v1223_v17, 0  ;;  %v1115_v38 = vperm.slane %v4219_v61, 5  ;;  %v3973_v39 = vld [vmem:[#allocation8 + $0x398] sm:$0xff]  ;;  %v3980_v57 = vld [vmem:[#allocation8 + $0x3d0] sm:$0xff] }
  0xf4   :  { %2569 = vmatpush.bf16.msra.mxu0 %v3922_v28  ;;  %2583 = vmatpush.bf16.msra.mxu1 %v3930_v29  ;;  %v979_v5 = vpop.f32.mrf.mxu0  ;;  %v993_v8 = vpop.f32.mrf.mxu1  ;;  %v3956_v28 = vld [vmem:[#allocation8 + $0x310] sm:$0xff] }
  0xf5   :  { %v1086_v11 = vpack.c.bf16 %v993_v8, %v979_v5  ;;  %v3964_v29 = vld [vmem:[#allocation8 + $0x350] sm:$0xff] }
  0xf6   :  { %2597 = vmatpush.bf16.msra.mxu2 %v3938_v54  ;;  %2611 = vmatpush.bf16.msra.mxu3 %v3946_v55  ;;  %v1140_v55 = vpack.c.bf16 %v1115_v38, %v1114_v37 }
  0xf7   :  { %v1254_v19 = vunpack.c.l.bf16 %v1086_v11  ;;  %v1255_v50 = vunpack.c.h.bf16 %v1086_v11  ;;  %v1116_v11 = vperm.slane %v4219_v61, 6 }
  0xf8   :  { %2618 = vmatpush.bf16.msrb.mxu0 %v3961_v32  ;;  %2632 = vmatpush.bf16.msrb.mxu1 %v3969_v33  ;;  %v1229_v32 = vperm.slane %v1227_v18, 0  ;;  %v1163_v8 = vunpack.c.h.b16 %v1140_v55 }
  0xf9   :  { %v1302_v34 = vadd.f32 %v1286_v20, %v1254_v19  ;;  %v1303_v35 = vadd.f32 %v1287_v21, %v1255_v50  ;;  %v1141_v50 = vpack.c.bf16 %v1117_v12, %v1116_v11 }
  0xfa   :  { %2646 = vmatpush.bf16.msrb.mxu2 %v3977_v58  ;;  %2660 = vmatpush.bf16.msrb.mxu3 %v3985_v59  ;;  %v1289_v48 = vunpack.c.l.bf16 %v1229_v32  ;;  %v1179_v19 = vpack.c.b16 %v1163_v8, %v1163_v8 }
  0xfb   :  { %v1382_v49 = vmax.f32 %v1302_v34, 0.0  ;;  %v1383_v51 = vmax.f32 %v1303_v35, 0.0 }
  0xfc   :  { %2619 = vmatpush.bf16.msrb.mxu0 %v3960_v46  ;;  %2633 = vmatpush.bf16.msrb.mxu1 %v3968_v47  ;;  %v1021_v25 = vpop.f32.mrf.mxu3  ;;  %v981_v27 = vpop.f32.mrf.mxu0  ;;  %v1288_v47 = vunpack.c.l.bf16 %v1225_v31 }
  0xfd   :  { %v1007_v22 = vpop.f32.mrf.mxu2  ;;  %v995_v33 = vpop.f32.mrf.mxu1 }
  0xfe   :  { %2647 = vmatpush.bf16.msrb.mxu2 %v3976_v3  ;;  %2661 = vmatpush.bf16.msrb.mxu3 %v3984_v4  ;;  %v1087_v30 = vpack.c.bf16 %v1021_v25, %v1007_v22  ;;  %v1094_v36 = vpack.c.bf16 %v995_v33, %v981_v27  ;;  %v1164_v25 = vunpack.c.l.b16 %v1141_v50  ;;  %v1165_v27 = vunpack.c.h.b16 %v1141_v50 }
 0x100   :  { %2620 = vmatpush.bf16.msrb.mxu0 %v3959_v60  ;;  %2634 = vmatpush.bf16.msrb.mxu1 %v3967_v62  ;;  %v1270_v41 = vunpack.c.l.bf16 %v1094_v36  ;;  %v1271_v42 = vunpack.c.h.bf16 %v1094_v36  ;;  %v1256_v45 = vunpack.c.l.bf16 %v1087_v30  ;;  %v1257_v46 = vunpack.c.h.bf16 %v1087_v30 }
 0x101   :  { %v1180_v33 = vpack.c.b16 %v1164_v25, %v1164_v25  ;;  %v1181_v34 = vpack.c.b16 %v1165_v27, %v1165_v27 }
 0x102   :  { %2648 = vmatpush.bf16.msrb.mxu2 %v3975_v14  ;;  %2662 = vmatpush.bf16.msrb.mxu3 %v3983_v15  ;;  %v1318_v52 = vadd.f32 %v1286_v20, %v1270_v41  ;;  %v1319_v53 = vadd.f32 %v1287_v21, %v1271_v42  ;;  %v1304_v62 = vadd.f32 %v1288_v47, %v1256_v45  ;;  %v3970_v20 = vld [vmem:[#allocation8 + $0x380] sm:$0xff] }
 0x103   :  { %v1305_v63 = vadd.f32 %v1289_v48, %v1257_v46  ;;  %v3978_v21 = vld [vmem:[#allocation8 + $0x3c0] sm:$0xff]  ;;  %v1243_v41 = vpack.i.b16 %v1181_v34, %v1181_v34 }
 0x104   :  { %2621 = vmatpush.bf16.msrb.mxu0 %v3958_v6  ;;  %2635 = vmatpush.bf16.msrb.mxu1 %v3966_v7  ;;  %v1398_v58 = vmax.f32 %v1318_v52, 0.0  ;;  %v1399_v59 = vmax.f32 %v1319_v53, 0.0  ;;  %v1023_v60 = vpop.f32.mrf.mxu3  ;;  %v1162_v7 = vunpack.c.l.b16 %v1140_v55  ;;  %v1384_v13 = vmax.f32 %v1304_v62, 0.0 }
 0x105   :  { %v1009_v54 = vpop.f32.mrf.mxu2  ;;  %v1385_v14 = vmax.f32 %v1305_v63, 0.0 }
 0x106   :  { %2649 = vmatpush.bf16.msrb.mxu2 %v3974_v23  ;;  %2663 = vmatpush.bf16.msrb.mxu3 %v3982_v24  ;;  %v1095_v0 = vpack.c.bf16 %v1023_v60, %v1009_v54  ;;  %v1414_v3 = vpack.c.bf16 %v1398_v58, %v1382_v49  ;;  %v1415_v4 = vpack.c.bf16 %v1399_v59, %v1383_v51  ;;  %v1245_v51 = vperm.slane %v1243_v41, 0 }
 0x107   :  { %v1178_v18 = vpack.c.b16 %v1162_v7, %v1162_v7  ;;  %v1235_v24 = vpack.i.b16 %v1179_v19, %v1179_v19 }
 0x108   :  { %2622 = vmatpush.bf16.msrb.mxu0 %v3957_v16  ;;  %2636 = vmatpush.bf16.msrb.mxu1 %v3965_v26  ;;  %v1272_v5 = vunpack.c.l.bf16 %v1095_v0  ;;  %v1273_v6 = vunpack.c.h.bf16 %v1095_v0  ;;  %v1293_v62 = vunpack.c.l.bf16 %v1245_v51 }
 0x109   :  { %2570 = vmatmul.bf16.vlgmr.msra.gmra.mxu0 %v1414_v3  ;;  %2584 = vmatmul.bf16.vlgmr.msra.gmra.mxu1 %v1415_v4  ;;  %v1231_v61 = vpack.i.b16 %v1178_v18, %v1178_v18  ;;  %v1237_v32 = vperm.slane %v1235_v24, 0 }
 0x10a   :  { %2650 = vmatpush.bf16.msrb.mxu2 %v3973_v39  ;;  %2664 = vmatpush.bf16.msrb.mxu3 %v3981_v40  ;;  %v1320_v15 = vadd.f32 %v1288_v47, %v1272_v5  ;;  %v1321_v16 = vadd.f32 %v1289_v48, %v1273_v6  ;;  %v1239_v40 = vpack.i.b16 %v1180_v33, %v1180_v33 }
 0x10b   :  { %v1233_v31 = vperm.slane %v1231_v61, 0  ;;  %v1291_v38 = vunpack.c.l.bf16 %v1237_v32 }
 0x10c   :  { %2623 = vmatpush.bf16.msrb.mxu0 %v3956_v28  ;;  %2637 = vmatpush.bf16.msrb.mxu1 %v3964_v29  ;;  %v1400_v26 = vmax.f32 %v1320_v15, 0.0  ;;  %v1401_v17 = vmax.f32 %v1321_v16, 0.0  ;;  %v1241_v49 = vperm.slane %v1239_v40, 0 }
 0x10d   :  { %v1290_v37 = vunpack.c.l.bf16 %v1233_v31 }
 0x10e   :  { %2651 = vmatpush.bf16.msrb.mxu2 %v3972_v56  ;;  %2665 = vmatpush.bf16.msrb.mxu3 %v3980_v57  ;;  %v1416_v22 = vpack.c.bf16 %v1400_v26, %v1384_v13  ;;  %v1417_v23 = vpack.c.bf16 %v1401_v17, %v1385_v14  ;;  %v1292_v60 = vunpack.c.l.bf16 %v1241_v49 }
 0x110   :  { %2624 = vmatpush.bf16.msrb.mxu0 %v3955_v43  ;;  %2638 = vmatpush.bf16.msrb.mxu1 %v3963_v44 }
 0x111   :  { %2598 = vmatmul.bf16.vlgmr.msra.gmra.mxu2 %v1416_v22  ;;  %2612 = vmatmul.bf16.vlgmr.msra.gmra.mxu3 %v1417_v23  ;;  %v3996_v22 = vld [vmem:[%s4241_s4] ss:$0 sm:$0xff]  ;;  %s4136_s4 = smov [#allocation10]  }
 0x112   :  { %2652 = vmatpush.bf16.msrb.mxu2 %v3971_v9  ;;  %2666 = vmatpush.bf16.msrb.mxu3 %v3979_v10  ;;  %s2684_s14 = sshll.u32 %s4136_s4, 4  ;;  %s2685_s14 = int_to_ptr.vmem [resolvable:$true] %s2684_s14 }
 0x114   :  { %2625 = vmatpush.bf16.msrb.mxu0 %v3954_v1  ;;  %2639 = vmatpush.bf16.msrb.mxu1 %v3962_v2  ;;  %v1035_v28 = vpop.f32.mrf.mxu0  ;;  %v1049_v29 = vpop.f32.mrf.mxu1 }
 0x115   :  { %v1088_v30 = vpack.c.bf16 %v1049_v29, %v1035_v28 }
 0x116   :  { %2653 = vmatpush.bf16.msrb.mxu2 %v3970_v20  ;;  %2667 = vmatpush.bf16.msrb.mxu3 %v3978_v21 }
 0x117   :  { %v1258_v35 = vunpack.c.l.bf16 %v1088_v30  ;;  %v1259_v36 = vunpack.c.h.bf16 %v1088_v30 }
 0x119   :  { %v1306_v45 = vadd.f32 %v1290_v37, %v1258_v35  ;;  %v1307_v46 = vadd.f32 %v1291_v38, %v1259_v36 }
 0x11b   :  { %v1386_v54 = vmax.f32 %v1306_v45, 0.0  ;;  %v1387_v55 = vmax.f32 %v1307_v46, 0.0 }
 0x11c   :  { %v1063_v39 = vpop.f32.mrf.mxu2  ;;  %v1077_v42 = vpop.f32.mrf.mxu3 }
 0x11d   :  { %v1037_v43 = vpop.f32.mrf.mxu0  ;;  %v1051_v44 = vpop.f32.mrf.mxu1  ;;  %v1089_v48 = vpack.c.bf16 %v1077_v42, %v1063_v39 }
 0x11e   :  { %v1096_v47 = vpack.c.bf16 %v1051_v44, %v1037_v43 }
 0x11f   :  { %v1260_v58 = vunpack.c.l.bf16 %v1089_v48  ;;  %v1261_v59 = vunpack.c.h.bf16 %v1089_v48 }
 0x120   :  { %v1274_v52 = vunpack.c.l.bf16 %v1096_v47  ;;  %v1275_v53 = vunpack.c.h.bf16 %v1096_v47 }
 0x121   :  { %v1308_v6 = vadd.f32 %v1292_v60, %v1260_v58  ;;  %v1309_v7 = vadd.f32 %v1293_v62, %v1261_v59 }
 0x122   :  { %v1322_v56 = vadd.f32 %v1290_v37, %v1274_v52  ;;  %v1323_v57 = vadd.f32 %v1291_v38, %v1275_v53 }
 0x123   :  { %v1388_v12 = vmax.f32 %v1308_v6, 0.0  ;;  %v1389_v13 = vmax.f32 %v1309_v7, 0.0 }
 0x124   :  { %v1065_v63 = vpop.f32.mrf.mxu2  ;;  %v1402_v0 = vmax.f32 %v1322_v56, 0.0  ;;  %v1403_v1 = vmax.f32 %v1323_v57, 0.0  ;;  %v1079_v2 = vpop.f32.mrf.mxu3 }
 0x125   :  { %v1097_v3 = vpack.c.bf16 %v1079_v2, %v1065_v63 }
 0x126   :  { %v1418_v4 = vpack.c.bf16 %v1402_v0, %v1386_v54  ;;  %v1419_v5 = vpack.c.bf16 %v1403_v1, %v1387_v55 }
 0x127   :  { %v1276_v8 = vunpack.c.l.bf16 %v1097_v3  ;;  %v1277_v9 = vunpack.c.h.bf16 %v1097_v3 }
 0x128   :  { %2626 = vmatmul.bf16.vlgmr.msrb.gmra.mxu0 %v1418_v4  ;;  %2640 = vmatmul.bf16.vlgmr.msrb.gmra.mxu1 %v1419_v5 }
 0x129   :  { %v1324_v10 = vadd.f32 %v1292_v60, %v1276_v8  ;;  %v1325_v11 = vadd.f32 %v1293_v62, %v1277_v9 }
 0x12b   :  { %v1404_v14 = vmax.f32 %v1324_v10, 0.0  ;;  %v1405_v15 = vmax.f32 %v1325_v11, 0.0 }
 0x12d   :  { %v1420_v16 = vpack.c.bf16 %v1404_v14, %v1388_v12  ;;  %v1421_v26 = vpack.c.bf16 %v1405_v15, %v1389_v13 }
 0x12f   :  { %2654 = vmatmul.bf16.vlgmr.msrb.gmra.mxu2 %v1420_v16  ;;  %2668 = vmatmul.bf16.vlgmr.msrb.gmra.mxu3 %v1421_v26 }
 0x146   :  { %v2459_v17 = vpop.f32.mrf.mxu0  ;;  %v2473_v18 = vpop.f32.mrf.mxu1 }
 0x147   :  { %v2460_v61 = vadd.f32 %v3996_v22, %v2459_v17 }
 0x149   :  { %v2474_v27 = vadd.f32 %v2473_v18, %v2460_v61 }
 0x14e   :  { %v2461_v19 = vpop.f32.mrf.mxu0  ;;  %v2475_v21 = vpop.f32.mrf.mxu1 }
 0x14f   :  { %v2462_v33 = vadd.f32 %v3996_v22, %v2461_v19 }
 0x151   :  { %v2476_v35 = vadd.f32 %v2475_v21, %v2462_v33 }
 0x154   :  { %v2487_v50 = vpop.f32.mrf.mxu2  ;;  %v2501_v20 = vpop.f32.mrf.mxu3 }
 0x155   :  { %v2488_v29 = vadd.f32 %v2487_v50, %v2474_v27 }
 0x157   :  { %v2502_v34 = vadd.f32 %v2501_v20, %v2488_v29 }
 0x15c   :  { %v2489_v24 = vpop.f32.mrf.mxu2  ;;  %v2503_v25 = vpop.f32.mrf.mxu3 }
 0x15d   :  { %v2490_v39 = vadd.f32 %v2489_v24, %v2476_v35 }
 0x15f   :  { %v2504_v43 = vadd.f32 %v2503_v25, %v2490_v39 }
 0x166   :  { %v2515_v23 = vpop.f32.mrf.mxu0  ;;  %v2529_v28 = vpop.f32.mrf.mxu1 }
 0x167   :  { %v2516_v37 = vadd.f32 %v2515_v23, %v2502_v34 }
 0x169   :  { %v2530_v42 = vadd.f32 %v2529_v28, %v2516_v37 }
 0x16e   :  { %v2517_v30 = vpop.f32.mrf.mxu0  ;;  %v2531_v36 = vpop.f32.mrf.mxu1 }
 0x16f   :  { %v2518_v46 = vadd.f32 %v2517_v30, %v2504_v43 }
 0x171   :  { %v2532_v52 = vadd.f32 %v2531_v36, %v2518_v46 }
 0x174   :  { %v2543_v31 = vpop.f32.mrf.mxu2  ;;  %v2557_v32 = vpop.f32.mrf.mxu3 }
 0x175   :  { %v2544_v44 = vadd.f32 %v2543_v31, %v2530_v42 }
 0x177   :  { %v2558_v47 = vadd.f32 %v2557_v32, %v2544_v44 }
 0x17c   :  { %v2545_v40 = vpop.f32.mrf.mxu2  ;;  %v2559_v41 = vpop.f32.mrf.mxu3 }
 0x17d   :  { %v2546_v54 = vadd.f32 %v2545_v40, %v2532_v52 }
 0x17f   :  { %v2560_v57 = vadd.f32 %v2559_v41, %v2546_v54 }
 0x186   :  { %v2571_v38 = vpop.f32.mrf.mxu0  ;;  %v2585_v45 = vpop.f32.mrf.mxu1 }
 0x187   :  { %v2572_v53 = vadd.f32 %v2571_v38, %v2558_v47 }
 0x189   :  { %v2586_v55 = vadd.f32 %v2585_v45, %v2572_v53 }
 0x18e   :  { %v2573_v48 = vpop.f32.mrf.mxu0  ;;  %v2587_v56 = vpop.f32.mrf.mxu1 }
 0x18f   :  { %v2574_v60 = vadd.f32 %v2573_v48, %v2560_v57 }
 0x191   :  { %v2588_v1 = vadd.f32 %v2587_v56, %v2574_v60 }
 0x194   :  { %v2599_v49 = vpop.f32.mrf.mxu2  ;;  %v2613_v51 = vpop.f32.mrf.mxu3 }
 0x195   :  { %v2600_v58 = vadd.f32 %v2599_v49, %v2586_v55 }
 0x197   :  { %v2614_v0 = vadd.f32 %v2613_v51, %v2600_v58 }
 0x19c   :  { %v2601_v62 = vpop.f32.mrf.mxu2  ;;  %v2615_v63 = vpop.f32.mrf.mxu3 }
 0x19d   :  { %v2602_v4 = vadd.f32 %v2601_v62, %v2588_v1 }
 0x19f   :  { %v2616_v9 = vadd.f32 %v2615_v63, %v2602_v4 }
 0x1a5   :  { %v2627_v59 = vpop.f32.mrf.mxu0  ;;  %v2641_v3 = vpop.f32.mrf.mxu1 }
 0x1a6   :  { %v2628_v2 = vadd.f32 %v2627_v59, %v2614_v0 }
 0x1a8   :  { %v2642_v5 = vadd.f32 %v2641_v3, %v2628_v2 }
 0x1ad   :  { %v2629_v6 = vpop.f32.mrf.mxu0  ;;  %v2643_v14 = vpop.f32.mrf.mxu1 }
 0x1ae   :  { %v2630_v11 = vadd.f32 %v2629_v6, %v2616_v9 }
 0x1b0   :  { %v2644_v15 = vadd.f32 %v2643_v14, %v2630_v11 }
 0x1b2   :  { %v2655_v7 = vpop.f32.mrf.mxu2  ;;  %v2669_v8 = vpop.f32.mrf.mxu3 }
 0x1b3   :  { %v2656_v10 = vadd.f32 %v2655_v7, %v2642_v5 }
 0x1b5   :  { %v2670_v12 = vadd.f32 %v2669_v8, %v2656_v10 }
 0x1b7   :  { %v2674_v13 = vmul.f32 0.1, %v2670_v12 }
 0x1b9   :  { %3997 = vtanh.f32 %v2674_v13 }
 0x1ba   :  { %v2657_v16 = vpop.f32.mrf.mxu2  ;;  %v2671_v17 = vpop.f32.mrf.mxu3 }
 0x1bb   :  { %v2658_v26 = vadd.f32 %v2657_v16, %v2644_v15 }
 0x1bd   :  { %v2672_v18 = vadd.f32 %v2671_v17, %v2658_v26 }
 0x1bf   :  { %v3998_v19 = vpop.eup %3997  ;;  %v2675_v50 = vmul.f32 0.1, %v2672_v18 }
 0x1c0   :  { %2678 = vst [vmem:[#allocation10] sm:$0xff] %v3998_v19 }
 0x1c1   :  { %3999 = vtanh.f32 %v2675_v50 }
 0x1c7   :  { %v4000_v20 = vpop.eup %3999 }
 0x1c8   :  { %2679 = vst [vmem:[#allocation10 + $0x8] sm:$0xff] %v4000_v20 }
 0x1c9   :  { %2692 = dma.vmem_to_hbm [thread:$0]  %s2685_s14, 256, %s2687_s17, [#allocation4], %s4137_s18, %s4137_s18, %s4138_s19  }
 0x1ca   :  { %4127 = dma.done.wait [#allocation4], 256  }
 0x1cb   :  { %4128 = vsyncadd [#allocation4], 4294967040 }
 0x1cc   :  { %2697 = vsyncpa [#allocation3], 1 }
 0x1cd   :  { %2698 = vsyncpa [#allocation6], 1 }
 0x1ce   :  { %2699 = vsyncpa [#allocation9], 1 }
 0x1cf   :  { %2700 = vsyncpa [#allocation4], 1 }

</bundles_post_ra>
